<compile_context>
chip_gen: v7x
topology: tpu7x:2x2x1
jax: 0.10.0
libtpu: 0.0.40
codegen_flags: <defaults>
</compile_context>

<pallas_src>
import functools
import math

import jax
import jax.numpy as jnp
from jax.experimental import pallas as pl
from jax.experimental.pallas import tpu as pltpu


def _leaky(x, alpha):
    # F.leaky_relu / nn.LeakyReLU(alpha)
    return jnp.where(x >= 0, x, alpha * x)


def _round_up(v, m):
    return ((v + m - 1) // m) * m


# ----------------------------------------------------------------------------
# Block / grid policy
# ----------------------------------------------------------------------------
def _block_policy(target_rows=None, min_steps=None):
    """Per-generation defaults.

    v7x has 2 TensorCores/chip -> keep >= 2 'parallel' grid steps.
    v5e/v6e are single-TC (the grid is a serial loop) -> fewer, bigger blocks
    amortize the ~0.35 us/step overhead and push DMAs into the >=512-row regime.
    """
    if target_rows is not None and min_steps is not None:
        return target_rows, min_steps
    try:
        kind = jax.devices()[0].device_kind.lower()
    except Exception:  # pragma: no cover
        kind = ""
    if "v7" in kind:
        d_rows, d_steps = 256, 2
    else:
        d_rows, d_steps = 512, 1
    return (target_rows if target_rows is not None else d_rows,
            min_steps if min_steps is not None else d_steps)


def _choose_b_blk(batch, n_nodes, target_rows, min_steps):
    b_blk = max(1, min(batch, max(1, target_rows // max(1, n_nodes))))
    if min_steps > 1 and batch >= min_steps and pl.cdiv(batch, b_blk) < min_steps:
        b_blk = pl.cdiv(batch, min_steps)
    return b_blk


def _vmem_estimate(b_blk, n, din, hp, mm_bytes, out_bytes, attention):
    rows = b_blk * n
    est = 2 * rows * din * mm_bytes * (2 if attention else 1)   # x (+y), 2-buffered
    est += 2 * rows * hp * out_bytes                             # out, 2-buffered
    w = din * hp + (hp * hp + hp * 2 * hp if attention else 0)
    est += w * mm_bytes + 4 * hp * 4                             # 1-buffered weights
    est += rows * hp * 4 * (8 if attention else 2)               # live f32 intermediates
    return est


def _compiler_params(vmem_estimate):
    kwargs = dict(dimension_semantics=("parallel",))
    if vmem_estimate > 24 * 1024 * 1024:
        # TODO(synk): 64 MiB cap targets v7x physical VMEM; v5e/v6e could go higher.
        kwargs["vmem_limit_bytes"] = min(64 * 1024 * 1024, int(1.5 * vmem_estimate))
    return pltpu.CompilerParams(**kwargs)


# ----------------------------------------------------------------------------
# One-time parameter preparation (hoisted off the per-call path)
# ----------------------------------------------------------------------------
def prepare_params(raw, *, matmul_dtype=jnp.float32):
    """Pad the hidden dim to a multiple of 128 lanes, fuse K|V into one weight,
    and cast matmul operands to `matmul_dtype`.

    bf16 operands are the fast path on v5e / v6e / v7x MXUs (halved DMA, higher
    MXU throughput); biases and all elementwise math / accumulation stay f32.
    """
    din, h = raw["fc_w"].shape
    hp = _round_up(h, 128)

    def pad2(w, rows, cols):
        return jnp.pad(w, ((0, rows - w.shape[0]), (0, cols - w.shape[1])))

    fc_w = pad2(raw["fc_w"], din, hp).astype(matmul_dtype)
    fc_b = pad2(raw["fc_b"], 1, hp).astype(jnp.float32)
    q_w = pad2(raw["q_w"], hp, hp).astype(matmul_dtype)
    q_b = pad2(raw["q_b"], 1, hp).astype(jnp.float32)
    kv_w = jnp.concatenate([pad2(raw["k_w"], hp, hp),
                            pad2(raw["v_w"], hp, hp)], axis=1).astype(matmul_dtype)
    kv_b = jnp.concatenate([pad2(raw["k_b"], 1, hp),
                            pad2(raw["v_b"], 1, hp)], axis=1).astype(jnp.float32)
    return dict(fc_w=fc_w, fc_b=fc_b, q_w=q_w, q_b=q_b, kv_w=kv_w, kv_b=kv_b,
                hidden_dim=h, hidden_pad=hp, in_dim=din, matmul_dtype=matmul_dtype)


# ----------------------------------------------------------------------------
# Kernels
# ----------------------------------------------------------------------------
def _attention_kernel(x_ref, y_ref, fcw_ref, fcb_ref, qw_ref, qb_ref,
                      kvw_ref, kvb_ref, o_ref, *, alpha, hdim):
    b_blk, n, din = x_ref.shape
    hp = qw_ref.shape[1]
    mm = qw_ref.dtype                       # matmul operand dtype (f32 or bf16)

    # fc on x and y: two M = b_blk*N matmuls against the same resident fc_w.
    x2 = x_ref[...].reshape(b_blk * n, din)
    y2 = y_ref[...].reshape(b_blk * n, din)
    xh = _leaky(jnp.dot(x2, fcw_ref[...], preferred_element_type=jnp.float32)
                + fcb_ref[...], alpha)      # leaky(fc(x)) : (b_blk*N, Hp), f32
    yh = _leaky(jnp.dot(y2, fcw_ref[...], preferred_element_type=jnp.float32)
                + fcb_ref[...], alpha)      # leaky(fc(y))

    # Q on xh, fused K|V on yh.
    q = jnp.dot(xh.astype(mm), qw_ref[...],
                preferred_element_type=jnp.float32) + qb_ref[...]
    kv = jnp.dot(yh.astype(mm), kvw_ref[...],
                 preferred_element_type=jnp.float32) + kvb_ref[...]
    k = kv[:, :hp]
    v = kv[:, hp:]

    # attention score + per-batch softmax over the node axis.
    # Padded lanes of q/k/v are exactly zero -> no effect on the score.
    scale = 1.0 / math.sqrt(float(hdim))    # original H, not padded Hp
    score = (jnp.sum(k * q, axis=-1, keepdims=True) * scale).reshape(b_blk, n, 1)
    m = jnp.max(score, axis=1, keepdims=True)            # (b_blk, 1, 1)
    p = jnp.exp(score - m)                                # unnormalized softmax
    z = jnp.sum(p, axis=1, keepdims=True)                 # (b_blk, 1, 1)

    # h = sum(leaky(v * e), axis=1) with e = p / z. leaky_relu is positively
    # homogeneous (z > 0), so fold 1/z with the final /2 into one per-batch scale.
    vp = v.reshape(b_blk, n, hp) * p
    hsum = jnp.sum(_leaky(vp, alpha), axis=1, keepdims=True)   # (b_blk, 1, Hp)

    inv_z = pl.reciprocal(z, approx=True)   # EUP slot; ~1e-3 relative error max
    o_ref[...] = (0.5 * xh.reshape(b_blk, n, hp)
                  + hsum * (0.5 * inv_z)).astype(o_ref.dtype)


def _fc_only_kernel(x_ref, fcw_ref, fcb_ref, o_ref, *, alpha):
    b_blk, n, din = x_ref.shape
    hp = o_ref.shape[-1]
    x2 = x_ref[...].reshape(b_blk * n, din)
    h = jnp.dot(x2, fcw_ref[...], preferred_element_type=jnp.float32) + fcb_ref[...]
    o_ref[...] = _leaky(h, alpha).reshape(b_blk, n, hp).astype(o_ref.dtype)


# ----------------------------------------------------------------------------
# Wrapper
# ----------------------------------------------------------------------------
def transformer_layer(params, x, y=None, *, alpha=0.2, out_dtype=jnp.float32,
                      trim_output=True, target_rows=None, min_steps=None):
    """Forward pass of TransformerLayer (eval mode).

    `params` must come from prepare_params().  Set `trim_output=False` to keep
    the lane-padded (B, N, Hp) output (skips an extra HBM read+write when the
    consumer tolerates padding); set `out_dtype=jnp.bfloat16` to halve output
    store traffic.
    """
    B, N, Din = x.shape
    H, Hp, mm = params["hidden_dim"], params["hidden_pad"], params["matmul_dtype"]
    assert Din == params["in_dim"]

    t_rows, m_steps = _block_policy(target_rows, min_steps)
    b_blk = _choose_b_blk(B, N, t_rows, m_steps)
    grid = (pl.cdiv(B, b_blk),)

    act_spec = pl.BlockSpec((b_blk, N, Din), lambda b: (b, 0, 0))
    out_spec = pl.BlockSpec((b_blk, N, Hp), lambda b: (b, 0, 0))
    out_shape = jax.ShapeDtypeStruct((B, N, Hp), out_dtype)

    def const_spec(shape, mode):
        # Constant-index weights: single-buffer when pipeline_mode is supported.
        if mode is None:
            return pl.BlockSpec(shape, lambda b: (0, 0))
        return pl.BlockSpec(shape, lambda b: (0, 0), pipeline_mode=mode)

    mm_bytes = jnp.dtype(mm).itemsize
    out_bytes = jnp.dtype(out_dtype).itemsize
    x = x.astype(mm)

    if y is None:
        cparams = _compiler_params(
            _vmem_estimate(b_blk, N, Din, Hp, mm_bytes, out_bytes, attention=False))

        def run(weight_mode):
            return pl.pallas_call(
                functools.partial(_fc_only_kernel, alpha=alpha),
                out_shape=out_shape,
                grid=grid,
                in_specs=[act_spec,
                          const_spec((Din, Hp), weight_mode),
                          const_spec((1, Hp), weight_mode)],
                out_specs=out_spec,
                compiler_params=cparams,
            )(x, params["fc_w"], params["fc_b"])

        try:
            out = run(pl.Buffered(1))
        except Exception:  # fallback: jax without BlockSpec pipeline_mode support
            out = run(None)
        return out[..., :H] if trim_output else out

    y = y.astype(mm)
    cparams = _compiler_params(
        _vmem_estimate(b_blk, N, Din, Hp, mm_bytes, out_bytes, attention=True))

    def run(weight_mode):
        return pl.pallas_call(
            functools.partial(_attention_kernel, alpha=alpha, hdim=H),
            out_shape=out_shape,
            grid=grid,
            in_specs=[act_spec, act_spec,
                      const_spec((Din, Hp), weight_mode),
                      const_spec((1, Hp), weight_mode),
                      const_spec((Hp, Hp), weight_mode),
                      const_spec((1, Hp), weight_mode),
                      const_spec((Hp, 2 * Hp), weight_mode),
                      const_spec((1, 2 * Hp), weight_mode)],
            out_specs=out_spec,
            compiler_params=cparams,
        )(x, y, params["fc_w"], params["fc_b"], params["q_w"], params["q_b"],
          params["kv_w"], params["kv_b"])

    try:
        out = run(pl.Buffered(1))
    except Exception:  # fallback: jax without BlockSpec pipeline_mode support
        out = run(None)
    return out[..., :H] if trim_output else out


# ----------------------------------------------------------------------------
# Pure-JAX reference (matches the PyTorch forward in eval mode)
# ----------------------------------------------------------------------------
def _reference_forward(raw, x, y, alpha):
    def lin(a, w, b):
        return a @ w + b
    xh = _leaky(lin(x, raw["fc_w"], raw["fc_b"]), alpha)
    yh = _leaky(lin(y, raw["fc_w"], raw["fc_b"]), alpha)
    q = lin(xh, raw["q_w"], raw["q_b"])
    k = lin(yh, raw["k_w"], raw["k_b"])
    v = lin(yh, raw["v_w"], raw["v_b"])
    score = jnp.sum(k * q, axis=-1, keepdims=True) / math.sqrt(q.shape[-1])
    e = jax.nn.softmax(score, axis=1)
    h = jnp.sum(_leaky(v * e, alpha), axis=1, keepdims=True)
    return (xh + h) / 2.0


if __name__ == "__main__":
    B, N, Din, H = 2, 8, 16, 32
    alpha = 0.2

    key = jax.random.PRNGKey(0)
    keys = jax.random.split(key, 12)

    def init_linear(kw, kb, fan_in, fan_out):
        bound = 1.0 / math.sqrt(fan_in)
        w = jax.random.uniform(kw, (fan_in, fan_out), jnp.float32, -bound, bound)
        b = jax.random.uniform(kb, (1, fan_out), jnp.float32, -bound, bound)
        return w, b

    fc_w, fc_b = init_linear(keys[0], keys[1], Din, H)
    q_w, q_b = init_linear(keys[2], keys[3], H, H)
    k_w, k_b = init_linear(keys[4], keys[5], H, H)
    v_w, v_b = init_linear(keys[6], keys[7], H, H)
    raw = dict(fc_w=fc_w, fc_b=fc_b, q_w=q_w, q_b=q_b,
               k_w=k_w, k_b=k_b, v_w=v_w, v_b=v_b)

    x = jax.random.normal(keys[8], (B, N, Din), jnp.float32)
    y = jax.random.normal(keys[9], (B, N, Din), jnp.float32)

    # One-time weight prep (padding / K|V fusion / cast) — off the per-call path.
    params = prepare_params(raw)

    # Full attention path (f32 matmuls).
    out = jax.block_until_ready(transformer_layer(params, x, y, alpha=alpha))
    ref = _reference_forward(raw, x, y, alpha)
    assert out.shape == (B, N, H)
    assert jnp.allclose(out, ref, atol=2e-3, rtol=2e-3), "mismatch vs reference"

    # y is None path: leaky_relu(fc(x)) — exact matmul path, tight check.
    out2 = jax.block_until_ready(transformer_layer(params, x, None, alpha=alpha))
    ref2 = _leaky(x @ fc_w + fc_b, alpha)
    assert out2.shape == (B, N, H)
    assert jnp.allclose(out2, ref2, atol=1e-5, rtol=1e-5), "mismatch (y=None)"

    # bf16 matmul operands (fast path on v5e/v6e/v7x); elementwise stays f32.
    params_bf16 = prepare_params(raw, matmul_dtype=jnp.bfloat16)
    out3 = jax.block_until_ready(transformer_layer(params_bf16, x, y, alpha=alpha))
    assert jnp.allclose(out3, ref, atol=5e-2, rtol=5e-2), "mismatch (bf16)"

    # Uneven batch (B % b_blk != 0 boundary block) + untrimmed padded output.
    x3 = jax.random.normal(keys[10], (3, N, Din), jnp.float32)
    y3 = jax.random.normal(keys[11], (3, N, Din), jnp.float32)
    out4 = jax.block_until_ready(
        transformer_layer(params, x3, y3, alpha=alpha,
                          target_rows=16, min_steps=1, trim_output=False))
    ref4 = _reference_forward(raw, x3, y3, alpha)
    assert out4.shape == (3, N, params["hidden_pad"])
    assert jnp.allclose(out4[..., :H], ref4, atol=2e-3, rtol=2e-3), "mismatch (B=3)"

    print("KERNEL_OK")
</pallas_src>

<mosaic_0001>
module attributes {stable_mosaic.version = 11 : i64} {
  func.func @_attention_kernel(%arg0: i32, %arg1: memref<2x8x16xf32, #tpu.memory_space<vmem>>, %arg2: memref<2x8x16xf32, #tpu.memory_space<vmem>>, %arg3: memref<16x128xf32, #tpu.memory_space<vmem>>, %arg4: memref<1x128xf32, #tpu.memory_space<vmem>>, %arg5: memref<128x128xf32, #tpu.memory_space<vmem>>, %arg6: memref<1x128xf32, #tpu.memory_space<vmem>>, %arg7: memref<128x256xf32, #tpu.memory_space<vmem>>, %arg8: memref<1x256xf32, #tpu.memory_space<vmem>>, %arg9: memref<2x8x128xf32, #tpu.memory_space<vmem>>) attributes {dimension_semantics = [#tpu.dimension_semantics<parallel>], iteration_bounds = array<i64: 1>, scalar_prefetch = 0 : i64, scratch_operands = 0 : i64, tpu.core_type = #tpu.core_type<tc>, window_params = [{transform_indices = @transform_0, window_bounds = array<i64: 2, 8, 16>}, {transform_indices = @transform_1, window_bounds = array<i64: 2, 8, 16>}, {pipeline_mode = #tpu.pipeline_mode<synchronous>, transform_indices = @transform_2, window_bounds = array<i64: 16, 128>}, {pipeline_mode = #tpu.pipeline_mode<synchronous>, transform_indices = @transform_3, window_bounds = array<i64: 1, 128>}, {pipeline_mode = #tpu.pipeline_mode<synchronous>, transform_indices = @transform_4, window_bounds = array<i64: 128, 128>}, {pipeline_mode = #tpu.pipeline_mode<synchronous>, transform_indices = @transform_5, window_bounds = array<i64: 1, 128>}, {pipeline_mode = #tpu.pipeline_mode<synchronous>, transform_indices = @transform_6, window_bounds = array<i64: 128, 256>}, {pipeline_mode = #tpu.pipeline_mode<synchronous>, transform_indices = @transform_7, window_bounds = array<i64: 1, 256>}, {transform_indices = @transform_8, window_bounds = array<i64: 2, 8, 128>}]} {
    %c0 = arith.constant 0 : index
    %c0_0 = arith.constant 0 : index
    %c0_1 = arith.constant 0 : index
    %0 = vector.load %arg1[%c0, %c0_0, %c0_1] : memref<2x8x16xf32, #tpu.memory_space<vmem>>, vector<2x8x16xf32>
    %1 = vector.shape_cast %0 : vector<2x8x16xf32> to vector<16x16xf32>
    %c0_2 = arith.constant 0 : index
    %c0_3 = arith.constant 0 : index
    %c0_4 = arith.constant 0 : index
    %2 = vector.load %arg2[%c0_2, %c0_3, %c0_4] : memref<2x8x16xf32, #tpu.memory_space<vmem>>, vector<2x8x16xf32>
    %3 = vector.shape_cast %2 : vector<2x8x16xf32> to vector<16x16xf32>
    %c0_5 = arith.constant 0 : index
    %c0_6 = arith.constant 0 : index
    %4 = vector.load %arg3[%c0_5, %c0_6] : memref<16x128xf32, #tpu.memory_space<vmem>>, vector<16x128xf32>
    %cst = arith.constant dense<0.000000e+00> : vector<16x128xf32>
    %5 = tpu.matmul %1, %4, %cst {dimension_numbers = #tpu.dot_dimension_numbers<[1], [0], [0], [1], [0, 0, 1, 1], [], []>} : vector<16x16xf32>, vector<16x128xf32>, vector<16x128xf32> -> vector<16x128xf32>
    %c0_7 = arith.constant 0 : index
    %c0_8 = arith.constant 0 : index
    %6 = vector.load %arg4[%c0_7, %c0_8] : memref<1x128xf32, #tpu.memory_space<vmem>>, vector<1x128xf32>
    %7 = vector.broadcast %6 : vector<1x128xf32> to vector<16x128xf32>
    %8 = arith.addf %5, %7 : vector<16x128xf32>
    %cst_9 = arith.constant 0.000000e+00 : f32
    %9 = vector.broadcast %cst_9 : f32 to vector<16x128xf32>
    %10 = arith.cmpf oge, %8, %9 : vector<16x128xf32>
    %cst_10 = arith.constant 2.000000e-01 : f32
    %11 = vector.broadcast %cst_10 : f32 to vector<16x128xf32>
    %12 = arith.mulf %11, %8 : vector<16x128xf32>
    %13 = arith.select %10, %8, %12 : vector<16x128xi1>, vector<16x128xf32>
    %c0_11 = arith.constant 0 : index
    %c0_12 = arith.constant 0 : index
    %14 = vector.load %arg3[%c0_11, %c0_12] : memref<16x128xf32, #tpu.memory_space<vmem>>, vector<16x128xf32>
    %cst_13 = arith.constant dense<0.000000e+00> : vector<16x128xf32>
    %15 = tpu.matmul %3, %14, %cst_13 {dimension_numbers = #tpu.dot_dimension_numbers<[1], [0], [0], [1], [0, 0, 1, 1], [], []>} : vector<16x16xf32>, vector<16x128xf32>, vector<16x128xf32> -> vector<16x128xf32>
    %c0_14 = arith.constant 0 : index
    %c0_15 = arith.constant 0 : index
    %16 = vector.load %arg4[%c0_14, %c0_15] : memref<1x128xf32, #tpu.memory_space<vmem>>, vector<1x128xf32>
    %17 = vector.broadcast %16 : vector<1x128xf32> to vector<16x128xf32>
    %18 = arith.addf %15, %17 : vector<16x128xf32>
    %cst_16 = arith.constant 0.000000e+00 : f32
    %19 = vector.broadcast %cst_16 : f32 to vector<16x128xf32>
    %20 = arith.cmpf oge, %18, %19 : vector<16x128xf32>
    %cst_17 = arith.constant 2.000000e-01 : f32
    %21 = vector.broadcast %cst_17 : f32 to vector<16x128xf32>
    %22 = arith.mulf %21, %18 : vector<16x128xf32>
    %23 = arith.select %20, %18, %22 : vector<16x128xi1>, vector<16x128xf32>
    %c0_18 = arith.constant 0 : index
    %c0_19 = arith.constant 0 : index
    %24 = vector.load %arg5[%c0_18, %c0_19] : memref<128x128xf32, #tpu.memory_space<vmem>>, vector<128x128xf32>
    %cst_20 = arith.constant dense<0.000000e+00> : vector<16x128xf32>
    %25 = tpu.matmul %13, %24, %cst_20 {dimension_numbers = #tpu.dot_dimension_numbers<[1], [0], [0], [1], [0, 0, 1, 1], [], []>} : vector<16x128xf32>, vector<128x128xf32>, vector<16x128xf32> -> vector<16x128xf32>
    %c0_21 = arith.constant 0 : index
    %c0_22 = arith.constant 0 : index
    %26 = vector.load %arg6[%c0_21, %c0_22] : memref<1x128xf32, #tpu.memory_space<vmem>>, vector<1x128xf32>
    %27 = vector.broadcast %26 : vector<1x128xf32> to vector<16x128xf32>
    %28 = arith.addf %25, %27 : vector<16x128xf32>
    %c0_23 = arith.constant 0 : index
    %c0_24 = arith.constant 0 : index
    %29 = vector.load %arg7[%c0_23, %c0_24] : memref<128x256xf32, #tpu.memory_space<vmem>>, vector<128x256xf32>
    %cst_25 = arith.constant dense<0.000000e+00> : vector<16x256xf32>
    %30 = tpu.matmul %23, %29, %cst_25 {dimension_numbers = #tpu.dot_dimension_numbers<[1], [0], [0], [1], [0, 0, 1, 1], [], []>} : vector<16x128xf32>, vector<128x256xf32>, vector<16x256xf32> -> vector<16x256xf32>
    %c0_26 = arith.constant 0 : index
    %c0_27 = arith.constant 0 : index
    %31 = vector.load %arg8[%c0_26, %c0_27] : memref<1x256xf32, #tpu.memory_space<vmem>>, vector<1x256xf32>
    %32 = vector.broadcast %31 : vector<1x256xf32> to vector<16x256xf32>
    %33 = arith.addf %30, %32 : vector<16x256xf32>
    %34 = vector.extract_strided_slice %33 {offsets = [0, 0], sizes = [16, 128], strides = [1, 1]} : vector<16x256xf32> to vector<16x128xf32>
    %35 = vector.extract_strided_slice %33 {offsets = [0, 128], sizes = [16, 128], strides = [1, 1]} : vector<16x256xf32> to vector<16x128xf32>
    %36 = arith.mulf %34, %28 : vector<16x128xf32>
    %cst_28 = arith.constant dense<0.000000e+00> : vector<16xf32>
    %37 = vector.multi_reduction <add>, %36, %cst_28 [1] : vector<16x128xf32> to vector<16xf32>
    %38 = vector.shape_cast %37 : vector<16xf32> to vector<16x1xf32>
    %cst_29 = arith.constant 0.176776692 : f32
    %39 = vector.broadcast %cst_29 : f32 to vector<16x1xf32>
    %40 = arith.mulf %38, %39 : vector<16x1xf32>
    %41 = vector.shape_cast %40 : vector<16x1xf32> to vector<2x8x1xf32>
    %cst_30 = arith.constant dense<0xFF800000> : vector<2x1xf32>
    %42 = vector.multi_reduction <maximumf>, %41, %cst_30 [1] : vector<2x8x1xf32> to vector<2x1xf32>
    %43 = vector.shape_cast %42 : vector<2x1xf32> to vector<2x1x1xf32>
    %44 = vector.broadcast %43 : vector<2x1x1xf32> to vector<2x8x1xf32>
    %45 = arith.subf %41, %44 : vector<2x8x1xf32>
    %46 = math.exp %45 : vector<2x8x1xf32>
    %cst_31 = arith.constant dense<0.000000e+00> : vector<2x1xf32>
    %47 = vector.multi_reduction <add>, %46, %cst_31 [1] : vector<2x8x1xf32> to vector<2x1xf32>
    %48 = vector.shape_cast %47 : vector<2x1xf32> to vector<2x1x1xf32>
    %49 = vector.shape_cast %35 : vector<16x128xf32> to vector<2x8x128xf32>
    %50 = vector.broadcast %46 : vector<2x8x1xf32> to vector<2x8x128xf32>
    %51 = arith.mulf %49, %50 : vector<2x8x128xf32>
    %cst_32 = arith.constant 0.000000e+00 : f32
    %52 = vector.broadcast %cst_32 : f32 to vector<2x8x128xf32>
    %53 = arith.cmpf oge, %51, %52 : vector<2x8x128xf32>
    %cst_33 = arith.constant 2.000000e-01 : f32
    %54 = vector.broadcast %cst_33 : f32 to vector<2x8x128xf32>
    %55 = arith.mulf %54, %51 : vector<2x8x128xf32>
    %56 = arith.select %53, %51, %55 : vector<2x8x128xi1>, vector<2x8x128xf32>
    %cst_34 = arith.constant dense<0.000000e+00> : vector<2x128xf32>
    %57 = vector.multi_reduction <add>, %56, %cst_34 [1] : vector<2x8x128xf32> to vector<2x128xf32>
    %58 = vector.shape_cast %57 : vector<2x128xf32> to vector<2x1x128xf32>
    %59 = tpu.reciprocal %48 {approx = true} : vector<2x1x1xf32> -> vector<2x1x1xf32>
    %60 = vector.shape_cast %13 : vector<16x128xf32> to vector<2x8x128xf32>
    %cst_35 = arith.constant 5.000000e-01 : f32
    %61 = vector.broadcast %cst_35 : f32 to vector<2x8x128xf32>
    %62 = arith.mulf %61, %60 : vector<2x8x128xf32>
    %cst_36 = arith.constant 5.000000e-01 : f32
    %63 = vector.broadcast %cst_36 : f32 to vector<2x1x1xf32>
    %64 = arith.mulf %63, %59 : vector<2x1x1xf32>
    %65 = vector.broadcast %64 : vector<2x1x1xf32> to vector<2x1x128xf32>
    %66 = arith.mulf %58, %65 : vector<2x1x128xf32>
    %67 = vector.broadcast %66 : vector<2x1x128xf32> to vector<2x8x128xf32>
    %68 = arith.addf %62, %67 : vector<2x8x128xf32>
    %c0_37 = arith.constant 0 : index
    %c0_38 = arith.constant 0 : index
    %c0_39 = arith.constant 0 : index
    %69 = vector.load %arg9[%c0_37, %c0_38, %c0_39] : memref<2x8x128xf32, #tpu.memory_space<vmem>>, vector<2x8x128xf32>
    tpu.vector_store %arg9[%c0_37, %c0_38, %c0_39], %68 {strides = array<i32>} : memref<2x8x128xf32, #tpu.memory_space<vmem>>, vector<2x8x128xf32>,
    return
  }
  func.func @transform_0(%arg0: i32) -> (i32, i32, i32) {
    %c0_i32 = arith.constant 0 : i32
    %c0_i32_0 = arith.constant 0 : i32
    %c0_i32_1 = arith.constant 0 : i32
    return %arg0, %c0_i32, %c0_i32_0 : i32, i32, i32
  }
  func.func @transform_1(%arg0: i32) -> (i32, i32, i32) {
    %c0_i32 = arith.constant 0 : i32
    %c0_i32_0 = arith.constant 0 : i32
    %c0_i32_1 = arith.constant 0 : i32
    return %arg0, %c0_i32, %c0_i32_0 : i32, i32, i32
  }
  func.func @transform_2(%arg0: i32) -> (i32, i32) {
    %c0_i32 = arith.constant 0 : i32
    %c0_i32_0 = arith.constant 0 : i32
    %c0_i32_1 = arith.constant 0 : i32
    return %c0_i32, %c0_i32_0 : i32, i32
  }
  func.func @transform_3(%arg0: i32) -> (i32, i32) {
    %c0_i32 = arith.constant 0 : i32
    %c0_i32_0 = arith.constant 0 : i32
    %c0_i32_1 = arith.constant 0 : i32
    return %c0_i32, %c0_i32_0 : i32, i32
  }
  func.func @transform_4(%arg0: i32) -> (i32, i32) {
    %c0_i32 = arith.constant 0 : i32
    %c0_i32_0 = arith.constant 0 : i32
    %c0_i32_1 = arith.constant 0 : i32
    return %c0_i32, %c0_i32_0 : i32, i32
  }
  func.func @transform_5(%arg0: i32) -> (i32, i32) {
    %c0_i32 = arith.constant 0 : i32
    %c0_i32_0 = arith.constant 0 : i32
    %c0_i32_1 = arith.constant 0 : i32
    return %c0_i32, %c0_i32_0 : i32, i32
  }
  func.func @transform_6(%arg0: i32) -> (i32, i32) {
    %c0_i32 = arith.constant 0 : i32
    %c0_i32_0 = arith.constant 0 : i32
    %c0_i32_1 = arith.constant 0 : i32
    return %c0_i32, %c0_i32_0 : i32, i32
  }
  func.func @transform_7(%arg0: i32) -> (i32, i32) {
    %c0_i32 = arith.constant 0 : i32
    %c0_i32_0 = arith.constant 0 : i32
    %c0_i32_1 = arith.constant 0 : i32
    return %c0_i32, %c0_i32_0 : i32, i32
  }
  func.func @transform_8(%arg0: i32) -> (i32, i32, i32) {
    %c0_i32 = arith.constant 0 : i32
    %c0_i32_0 = arith.constant 0 : i32
    %c0_i32_1 = arith.constant 0 : i32
    return %arg0, %c0_i32, %c0_i32_0 : i32, i32, i32
  }
}

module attributes {stable_mosaic.version = 11 : i64} {
  func.func @_attention_kernel(%arg0: i32, %arg1: memref<2x8x16xf32, #tpu.memory_space<vmem>>, %arg2: memref<2x8x16xf32, #tpu.memory_space<vmem>>, %arg3: memref<16x128xf32, #tpu.memory_space<vmem>>, %arg4: memref<1x128xf32, #tpu.memory_space<vmem>>, %arg5: memref<128x128xf32, #tpu.memory_space<vmem>>, %arg6: memref<1x128xf32, #tpu.memory_space<vmem>>, %arg7: memref<128x256xf32, #tpu.memory_space<vmem>>, %arg8: memref<1x256xf32, #tpu.memory_space<vmem>>, %arg9: memref<2x8x128xf32, #tpu.memory_space<vmem>>) attributes {dimension_semantics = [#tpu.dimension_semantics<parallel>], iteration_bounds = array<i64: 1>, scalar_prefetch = 0 : i64, scratch_operands = 0 : i64, tpu.core_type = #tpu.core_type<tc>, window_params = [{transform_indices = @transform_0, window_bounds = array<i64: 2, 8, 16>}, {transform_indices = @transform_1, window_bounds = array<i64: 2, 8, 16>}, {pipeline_mode = #tpu.pipeline_mode<synchronous>, transform_indices = @transform_2, window_bounds = array<i64: 16, 128>}, {pipeline_mode = #tpu.pipeline_mode<synchronous>, transform_indices = @transform_3, window_bounds = array<i64: 1, 128>}, {pipeline_mode = #tpu.pipeline_mode<synchronous>, transform_indices = @transform_4, window_bounds = array<i64: 128, 128>}, {pipeline_mode = #tpu.pipeline_mode<synchronous>, transform_indices = @transform_5, window_bounds = array<i64: 1, 128>}, {pipeline_mode = #tpu.pipeline_mode<synchronous>, transform_indices = @transform_6, window_bounds = array<i64: 128, 256>}, {pipeline_mode = #tpu.pipeline_mode<synchronous>, transform_indices = @transform_7, window_bounds = array<i64: 1, 256>}, {transform_indices = @transform_8, window_bounds = array<i64: 2, 8, 128>}]} {
    %c0 = arith.constant 0 : index
    %c0_0 = arith.constant 0 : index
    %c0_1 = arith.constant 0 : index
    %0 = vector.load %arg1[%c0, %c0_0, %c0_1] : memref<2x8x16xf32, #tpu.memory_space<vmem>>, vector<2x8x16xf32>
    %1 = vector.shape_cast %0 : vector<2x8x16xf32> to vector<16x16xf32>
    %c0_2 = arith.constant 0 : index
    %c0_3 = arith.constant 0 : index
    %c0_4 = arith.constant 0 : index
    %2 = vector.load %arg2[%c0_2, %c0_3, %c0_4] : memref<2x8x16xf32, #tpu.memory_space<vmem>>, vector<2x8x16xf32>
    %3 = vector.shape_cast %2 : vector<2x8x16xf32> to vector<16x16xf32>
    %c0_5 = arith.constant 0 : index
    %c0_6 = arith.constant 0 : index
    %4 = vector.load %arg3[%c0_5, %c0_6] : memref<16x128xf32, #tpu.memory_space<vmem>>, vector<16x128xf32>
    %cst = arith.constant dense<0.000000e+00> : vector<16x128xf32>
    %5 = tpu.matmul %1, %4, %cst {dimension_numbers = #tpu.dot_dimension_numbers<[1], [0], [0], [1], [0, 0, 1, 1], [], []>} : vector<16x16xf32>, vector<16x128xf32>, vector<16x128xf32> -> vector<16x128xf32>
    %c0_7 = arith.constant 0 : index
    %c0_8 = arith.constant 0 : index
    %6 = vector.load %arg4[%c0_7, %c0_8] : memref<1x128xf32, #tpu.memory_space<vmem>>, vector<1x128xf32>
    %7 = vector.broadcast %6 : vector<1x128xf32> to vector<16x128xf32>
    %8 = arith.addf %5, %7 : vector<16x128xf32>
    %cst_9 = arith.constant 0.000000e+00 : f32
    %9 = vector.broadcast %cst_9 : f32 to vector<16x128xf32>
    %10 = arith.cmpf oge, %8, %9 : vector<16x128xf32>
    %cst_10 = arith.constant 2.000000e-01 : f32
    %11 = vector.broadcast %cst_10 : f32 to vector<16x128xf32>
    %12 = arith.mulf %11, %8 : vector<16x128xf32>
    %13 = arith.select %10, %8, %12 : vector<16x128xi1>, vector<16x128xf32>
    %c0_11 = arith.constant 0 : index
    %c0_12 = arith.constant 0 : index
    %14 = vector.load %arg3[%c0_11, %c0_12] : memref<16x128xf32, #tpu.memory_space<vmem>>, vector<16x128xf32>
    %cst_13 = arith.constant dense<0.000000e+00> : vector<16x128xf32>
    %15 = tpu.matmul %3, %14, %cst_13 {dimension_numbers = #tpu.dot_dimension_numbers<[1], [0], [0], [1], [0, 0, 1, 1], [], []>} : vector<16x16xf32>, vector<16x128xf32>, vector<16x128xf32> -> vector<16x128xf32>
    %c0_14 = arith.constant 0 : index
    %c0_15 = arith.constant 0 : index
    %16 = vector.load %arg4[%c0_14, %c0_15] : memref<1x128xf32, #tpu.memory_space<vmem>>, vector<1x128xf32>
    %17 = vector.broadcast %16 : vector<1x128xf32> to vector<16x128xf32>
    %18 = arith.addf %15, %17 : vector<16x128xf32>
    %cst_16 = arith.constant 0.000000e+00 : f32
    %19 = vector.broadcast %cst_16 : f32 to vector<16x128xf32>
    %20 = arith.cmpf oge, %18, %19 : vector<16x128xf32>
    %cst_17 = arith.constant 2.000000e-01 : f32
    %21 = vector.broadcast %cst_17 : f32 to vector<16x128xf32>
    %22 = arith.mulf %21, %18 : vector<16x128xf32>
    %23 = arith.select %20, %18, %22 : vector<16x128xi1>, vector<16x128xf32>
    %c0_18 = arith.constant 0 : index
    %c0_19 = arith.constant 0 : index
    %24 = vector.load %arg5[%c0_18, %c0_19] : memref<128x128xf32, #tpu.memory_space<vmem>>, vector<128x128xf32>
    %cst_20 = arith.constant dense<0.000000e+00> : vector<16x128xf32>
    %25 = tpu.matmul %13, %24, %cst_20 {dimension_numbers = #tpu.dot_dimension_numbers<[1], [0], [0], [1], [0, 0, 1, 1], [], []>} : vector<16x128xf32>, vector<128x128xf32>, vector<16x128xf32> -> vector<16x128xf32>
    %c0_21 = arith.constant 0 : index
    %c0_22 = arith.constant 0 : index
    %26 = vector.load %arg6[%c0_21, %c0_22] : memref<1x128xf32, #tpu.memory_space<vmem>>, vector<1x128xf32>
    %27 = vector.broadcast %26 : vector<1x128xf32> to vector<16x128xf32>
    %28 = arith.addf %25, %27 : vector<16x128xf32>
    %c0_23 = arith.constant 0 : index
    %c0_24 = arith.constant 0 : index
    %29 = vector.load %arg7[%c0_23, %c0_24] : memref<128x256xf32, #tpu.memory_space<vmem>>, vector<128x256xf32>
    %cst_25 = arith.constant dense<0.000000e+00> : vector<16x256xf32>
    %30 = tpu.matmul %23, %29, %cst_25 {dimension_numbers = #tpu.dot_dimension_numbers<[1], [0], [0], [1], [0, 0, 1, 1], [], []>} : vector<16x128xf32>, vector<128x256xf32>, vector<16x256xf32> -> vector<16x256xf32>
    %c0_26 = arith.constant 0 : index
    %c0_27 = arith.constant 0 : index
    %31 = vector.load %arg8[%c0_26, %c0_27] : memref<1x256xf32, #tpu.memory_space<vmem>>, vector<1x256xf32>
    %32 = vector.broadcast %31 : vector<1x256xf32> to vector<16x256xf32>
    %33 = arith.addf %30, %32 : vector<16x256xf32>
    %34 = vector.extract_strided_slice %33 {offsets = [0, 0], sizes = [16, 128], strides = [1, 1]} : vector<16x256xf32> to vector<16x128xf32>
    %35 = vector.extract_strided_slice %33 {offsets = [0, 128], sizes = [16, 128], strides = [1, 1]} : vector<16x256xf32> to vector<16x128xf32>
    %36 = arith.mulf %34, %28 : vector<16x128xf32>
    %cst_28 = arith.constant dense<0.000000e+00> : vector<16xf32>
    %37 = vector.multi_reduction <add>, %36, %cst_28 [1] : vector<16x128xf32> to vector<16xf32>
    %38 = vector.shape_cast %37 : vector<16xf32> to vector<16x1xf32>
    %cst_29 = arith.constant 0.176776692 : f32
    %39 = vector.broadcast %cst_29 : f32 to vector<16x1xf32>
    %40 = arith.mulf %38, %39 : vector<16x1xf32>
    %41 = vector.shape_cast %40 : vector<16x1xf32> to vector<2x8x1xf32>
    %cst_30 = arith.constant dense<0xFF800000> : vector<2x1xf32>
    %42 = vector.multi_reduction <maximumf>, %41, %cst_30 [1] : vector<2x8x1xf32> to vector<2x1xf32>
    %43 = vector.shape_cast %42 : vector<2x1xf32> to vector<2x1x1xf32>
    %44 = vector.broadcast %43 : vector<2x1x1xf32> to vector<2x8x1xf32>
    %45 = arith.subf %41, %44 : vector<2x8x1xf32>
    %46 = math.exp %45 : vector<2x8x1xf32>
    %cst_31 = arith.constant dense<0.000000e+00> : vector<2x1xf32>
    %47 = vector.multi_reduction <add>, %46, %cst_31 [1] : vector<2x8x1xf32> to vector<2x1xf32>
    %48 = vector.shape_cast %47 : vector<2x1xf32> to vector<2x1x1xf32>
    %49 = vector.shape_cast %35 : vector<16x128xf32> to vector<2x8x128xf32>
    %50 = vector.broadcast %46 : vector<2x8x1xf32> to vector<2x8x128xf32>
    %51 = arith.mulf %49, %50 : vector<2x8x128xf32>
    %cst_32 = arith.constant 0.000000e+00 : f32
    %52 = vector.broadcast %cst_32 : f32 to vector<2x8x128xf32>
    %53 = arith.cmpf oge, %51, %52 : vector<2x8x128xf32>
    %cst_33 = arith.constant 2.000000e-01 : f32
    %54 = vector.broadcast %cst_33 : f32 to vector<2x8x128xf32>
    %55 = arith.mulf %54, %51 : vector<2x8x128xf32>
    %56 = arith.select %53, %51, %55 : vector<2x8x128xi1>, vector<2x8x128xf32>
    %cst_34 = arith.constant dense<0.000000e+00> : vector<2x128xf32>
    %57 = vector.multi_reduction <add>, %56, %cst_34 [1] : vector<2x8x128xf32> to vector<2x128xf32>
    %58 = vector.shape_cast %57 : vector<2x128xf32> to vector<2x1x128xf32>
    %59 = tpu.reciprocal %48 {approx = true} : vector<2x1x1xf32> -> vector<2x1x1xf32>
    %60 = vector.shape_cast %13 : vector<16x128xf32> to vector<2x8x128xf32>
    %cst_35 = arith.constant 5.000000e-01 : f32
    %61 = vector.broadcast %cst_35 : f32 to vector<2x8x128xf32>
    %62 = arith.mulf %61, %60 : vector<2x8x128xf32>
    %cst_36 = arith.constant 5.000000e-01 : f32
    %63 = vector.broadcast %cst_36 : f32 to vector<2x1x1xf32>
    %64 = arith.mulf %63, %59 : vector<2x1x1xf32>
    %65 = vector.broadcast %64 : vector<2x1x1xf32> to vector<2x1x128xf32>
    %66 = arith.mulf %58, %65 : vector<2x1x128xf32>
    %67 = vector.broadcast %66 : vector<2x1x128xf32> to vector<2x8x128xf32>
    %68 = arith.addf %62, %67 : vector<2x8x128xf32>
    %c0_37 = arith.constant 0 : index
    %c0_38 = arith.constant 0 : index
    %c0_39 = arith.constant 0 : index
    %69 = vector.load %arg9[%c0_37, %c0_38, %c0_39] : memref<2x8x128xf32, #tpu.memory_space<vmem>>, vector<2x8x128xf32>
    tpu.vector_store %arg9[%c0_37, %c0_38, %c0_39], %68 {strides = array<i32>} : memref<2x8x128xf32, #tpu.memory_space<vmem>>, vector<2x8x128xf32>,
    return
  }
  func.func @transform_0(%arg0: i32) -> (i32, i32, i32) {
    %c0_i32 = arith.constant 0 : i32
    %c0_i32_0 = arith.constant 0 : i32
    %c0_i32_1 = arith.constant 0 : i32
    return %arg0, %c0_i32, %c0_i32_0 : i32, i32, i32
  }
  func.func @transform_1(%arg0: i32) -> (i32, i32, i32) {
    %c0_i32 = arith.constant 0 : i32
    %c0_i32_0 = arith.constant 0 : i32
    %c0_i32_1 = arith.constant 0 : i32
    return %arg0, %c0_i32, %c0_i32_0 : i32, i32, i32
  }
  func.func @transform_2(%arg0: i32) -> (i32, i32) {
    %c0_i32 = arith.constant 0 : i32
    %c0_i32_0 = arith.constant 0 : i32
    %c0_i32_1 = arith.constant 0 : i32
    return %c0_i32, %c0_i32_0 : i32, i32
  }
  func.func @transform_3(%arg0: i32) -> (i32, i32) {
    %c0_i32 = arith.constant 0 : i32
    %c0_i32_0 = arith.constant 0 : i32
    %c0_i32_1 = arith.constant 0 : i32
    return %c0_i32, %c0_i32_0 : i32, i32
  }
  func.func @transform_4(%arg0: i32) -> (i32, i32) {
    %c0_i32 = arith.constant 0 : i32
    %c0_i32_0 = arith.constant 0 : i32
    %c0_i32_1 = arith.constant 0 : i32
    return %c0_i32, %c0_i32_0 : i32, i32
  }
  func.func @transform_5(%arg0: i32) -> (i32, i32) {
    %c0_i32 = arith.constant 0 : i32
    %c0_i32_0 = arith.constant 0 : i32
    %c0_i32_1 = arith.constant 0 : i32
    return %c0_i32, %c0_i32_0 : i32, i32
  }
  func.func @transform_6(%arg0: i32) -> (i32, i32) {
    %c0_i32 = arith.constant 0 : i32
    %c0_i32_0 = arith.constant 0 : i32
    %c0_i32_1 = arith.constant 0 : i32
    return %c0_i32, %c0_i32_0 : i32, i32
  }
  func.func @transform_7(%arg0: i32) -> (i32, i32) {
    %c0_i32 = arith.constant 0 : i32
    %c0_i32_0 = arith.constant 0 : i32
    %c0_i32_1 = arith.constant 0 : i32
    return %c0_i32, %c0_i32_0 : i32, i32
  }
  func.func @transform_8(%arg0: i32) -> (i32, i32, i32) {
    %c0_i32 = arith.constant 0 : i32
    %c0_i32_0 = arith.constant 0 : i32
    %c0_i32_1 = arith.constant 0 : i32
    return %arg0, %c0_i32, %c0_i32_0 : i32, i32, i32
  }
}

</mosaic_0001>

<bundles_post_ra>
// kernel: tpu_custom_call.1
= control target key start
LH: loop header
LB: loop body
LE: loop exit
PB: predicated region body
PF: predicated region fallthrough
CT: control target
= control target key end

     0   :  { %13 = vsyncpa [#allocation3], 0  ;;  %s1084_s0 = inlined_call_operand.hbm [shape: f32[2,8,16], index: 0, kind: input, shape index: {}]   ;;  %s1085_s1 = inlined_call_operand.hbm [shape: f32[2,8,16], index: 1, kind: input, shape index: {}]   ;;  %s1086_s2 = inlined_call_operand.hbm [shape: f32[16,128], index: 2, kind: input, shape index: {}]   ;;  %s1087_s3 = inlined_call_operand.vmem [shape: f32[1,128], index: 3, kind: input, shape index: {}]   ;;  %s1088_s4 = inlined_call_operand.hbm [shape: f32[128,128], index: 4, kind: input, shape index: {}]   ;;  %s1089_s5 = inlined_call_operand.vmem [shape: f32[1,128], index: 5, kind: input, shape index: {}]   ;;  %s1090_s6 = inlined_call_operand.hbm [shape: f32[128,256], index: 6, kind: input, shape index: {}]   ;;  %s1091_s7 = inlined_call_operand.vmem [shape: f32[1,256], index: 7, kind: input, shape index: {}]   ;;  %s1092_s8 = inlined_call_operand.hbm [shape: f32[2,8,128], index: 8, kind: output, shape index: {}]  }
   0x1   :  { %14 = vsyncpa [#allocation6], 0 }
   0x2   :  { %15 = vsyncpa [#allocation9], 0 }
   0x3   :  { %16 = vsyncpa [#allocation4], 0  ;;  %s906_s27 = smov [#allocation5]   ;;  %s907_s29 = smov [#allocation8]  }
   0x4   :  { %s34_s28 = sshll.u32 %s906_s27, 4  ;;  %s60_s30 = sshll.u32 %s907_s29, 4  ;;  %s35_s28 = int_to_ptr.vmem [resolvable:$true] %s34_s28  ;;  %s962_s30 = int_to_ptr.vmem [resolvable:$true] %s60_s30 }
   0x5   :  { %s766_s11 = scalar_lea.hbm %s1085_s1, 256 }
   0x6   :  { %p767_p0 = scmp.ne.s32.totalorder %s1085_s1, %s766_s11  ;;  %p770_p1 = scmp.lt.u32.totalorder %s766_s11, %s1085_s1 }
   0x8   :  { %p772_p2 = pnand %p770_p1, %p767_p0 }
   0xa   :  { %775 = shalt.err (!%p772_p2)
}
   0xb   :  { %s776_s16 = scalar_lea.vmem %s35_s28, 256  ;;  %p781_p4 = scmp.lt.s32.totalorder %s35_s28, %s35_s28 }
   0xc   :  { %p777_p3 = scmp.ne.s32.totalorder %s35_s28, %s776_s16  ;;  %p782_p5 = scmp.lt.s32.totalorder %s776_s16, %s776_s16 }
   0xe   :  { %p783_p6 = por %p782_p5, %p781_p4 }
  0x10   :  { %p784_p7 = pnand %p783_p6, %p777_p3 }
  0x12   :  { %787 = shalt.err (!%p784_p7)
}
  0x13   :  { %s908_s17 = smov 128   ;;  %s909_s18 = smov 8  }
  0x14   :  { %40 = dma.hbm_to_vmem [thread:$0]  %s1085_s1, 256, %s35_s28, [#allocation6], %s908_s17, %s908_s17, %s909_s18  }
  0x15   :  { %s788_s23 = scalar_lea.hbm %s1088_s4, 2048 }
  0x16   :  { %p789_p8 = scmp.ne.s32.totalorder %s1088_s4, %s788_s23  ;;  %p792_p9 = scmp.lt.u32.totalorder %s788_s23, %s1088_s4 }
  0x18   :  { %p794_p10 = pnand %p792_p9, %p789_p8 }
  0x1a   :  { %797 = shalt.err (!%p794_p10)
}
  0x1b   :  { %s798_s29 = scalar_lea.vmem %s962_s30, 2048  ;;  %p803_p12 = scmp.lt.s32.totalorder %s962_s30, %s962_s30 }
  0x1c   :  { %p799_p11 = scmp.ne.s32.totalorder %s962_s30, %s798_s29  ;;  %p804_p13 = scmp.lt.s32.totalorder %s798_s29, %s798_s29 }
  0x1e   :  { %p805_p0 = por %p804_p13, %p803_p12 }
  0x20   :  { %p806_p1 = pnand %p805_p0, %p799_p11 }
  0x22   :  { %809 = shalt.err (!%p806_p1)
}
  0x23   :  { %66 = dma.hbm_to_vmem [thread:$0]  %s1088_s4, 2048, %s962_s30, [#allocation9], %s908_s17, %s908_s17, %s909_s18  }
  0x24   :  { %s910_s9 = smov [#allocation2]   ;;  %s911_s11 = smov [#allocation7]  }
  0x25   :  { %s22_s10 = sshll.u32 %s910_s9, 4  ;;  %s46_s12 = sshll.u32 %s911_s11, 4  ;;  %s23_s10 = int_to_ptr.vmem [resolvable:$true] %s22_s10  ;;  %s999_s12 = int_to_ptr.vmem [resolvable:$true] %s46_s12 }
  0x26   :  { %s810_s15 = scalar_lea.hbm %s1084_s0, 256 }
  0x27   :  { %p811_p2 = scmp.ne.s32.totalorder %s1084_s0, %s810_s15  ;;  %p814_p3 = scmp.lt.u32.totalorder %s810_s15, %s1084_s0 }
  0x29   :  { %p816_p4 = pnand %p814_p3, %p811_p2 }
  0x2b   :  { %819 = shalt.err (!%p816_p4)
}
  0x2c   :  { %s820_s4 = scalar_lea.vmem %s23_s10, 256  ;;  %p825_p6 = scmp.lt.s32.totalorder %s23_s10, %s23_s10 }
  0x2d   :  { %p821_p5 = scmp.ne.s32.totalorder %s23_s10, %s820_s4  ;;  %p826_p7 = scmp.lt.s32.totalorder %s820_s4, %s820_s4 }
  0x2f   :  { %p827_p8 = por %p826_p7, %p825_p6 }
  0x31   :  { %p828_p9 = pnand %p827_p8, %p821_p5 }
  0x33   :  { %831 = shalt.err (!%p828_p9)
}
  0x34   :  { %28 = dma.hbm_to_vmem [thread:$0]  %s1084_s0, 256, %s23_s10, [#allocation3], %s908_s17, %s908_s17, %s909_s18  }
  0x35   :  { %s832_s25 = scalar_lea.hbm %s1086_s2, 256 }
  0x36   :  { %p833_p10 = scmp.ne.s32.totalorder %s1086_s2, %s832_s25  ;;  %p836_p11 = scmp.lt.u32.totalorder %s832_s25, %s1086_s2 }
  0x38   :  { %p838_p12 = pnand %p836_p11, %p833_p10 }
  0x3a   :  { %841 = shalt.err (!%p838_p12)
}
  0x3b   :  { %s842_s28 = scalar_lea.vmem %s999_s12, 256  ;;  %p847_p0 = scmp.lt.s32.totalorder %s999_s12, %s999_s12 }
  0x3c   :  { %p843_p13 = scmp.ne.s32.totalorder %s999_s12, %s842_s28  ;;  %p848_p1 = scmp.lt.s32.totalorder %s842_s28, %s842_s28 }
  0x3e   :  { %p849_p2 = por %p848_p1, %p847_p0 }
  0x40   :  { %p850_p3 = pnand %p849_p2, %p843_p13 }
  0x42   :  { %853 = shalt.err (!%p850_p3)
}
  0x43   :  { %52 = dma.hbm_to_vmem [thread:$0]  %s1086_s2, 256, %s999_s12, [#allocation6], %s908_s17, %s908_s17, %s909_s18  }
  0x44   :  { %s912_s10 = smov [#allocation10]   ;;  %s854_s15 = scalar_lea.hbm %s1090_s6, 4096 }
  0x45   :  { %s74_s11 = sshll.u32 %s912_s10, 4  ;;  %p855_p4 = scmp.ne.s32.totalorder %s1090_s6, %s854_s15  ;;  %s75_s11 = int_to_ptr.vmem [resolvable:$true] %s74_s11 }
  0x46   :  { %p858_p5 = scmp.lt.u32.totalorder %s854_s15, %s1090_s6 }
  0x48   :  { %p860_p6 = pnand %p858_p5, %p855_p4 }
  0x4a   :  { %863 = shalt.err (!%p860_p6)
}
  0x4b   :  { %s864_s4 = scalar_lea.vmem %s75_s11, 4096  ;;  %p869_p8 = scmp.lt.s32.totalorder %s75_s11, %s75_s11 }
  0x4c   :  { %p865_p7 = scmp.ne.s32.totalorder %s75_s11, %s864_s4  ;;  %p870_p9 = scmp.lt.s32.totalorder %s864_s4, %s864_s4 }
  0x4e   :  { %p871_p10 = por %p870_p9, %p869_p8 }
  0x50   :  { %p872_p11 = pnand %p871_p10, %p865_p7 }
  0x52   :  { %875 = shalt.err (!%p872_p11)
}
  0x53   :  { %s913_s2 = smov 256   ;;  %s914_s12 = smov 16  }
  0x54   :  { %80 = dma.hbm_to_vmem [thread:$0]  %s1090_s6, 4096, %s75_s11, [#allocation9], %s913_s2, %s913_s2, %s914_s12  }
  0x55   :  { %898 = dma.done.wait [#allocation3], 256  }
  0x56   :  { %899 = vsyncadd [#allocation3], 4294967040 }
  0x57   :  { %900 = dma.done.wait [#allocation6], 512  }
  0x58   :  { %901 = vsyncadd [#allocation6], 4294966784 }
  0x59   :  { %902 = dma.done.wait [#allocation9], 6144  }
  0x5a   :  { %903 = vsyncadd [#allocation9], 4294961152  ;;  %vm111_vm0 = vcmask 130048   ;;  %v102_v0 = vld [vmem:[#allocation7] sm:$0xff]  ;;  %v103_v1 = vld [vmem:[#allocation7 + $0x8] sm:$0xff] }
  0x5b   :  { %v98_v2 = vld [vmem:[#allocation2] sm:$0xff]  ;;  %v675_v3 = vpack.c.bf16 %v103_v1, %v102_v0  ;;  %v100_v4 = vld [vmem:[#allocation5] sm:$0xff]  ;;  %v99_v5 = vld [vmem:[#allocation2 + $0x8] sm:$0xff] }
  0x5c   :  { %630 = vmatprep.mubr.msk.f32.mxu0 %vm111_vm0, %v98_v2  ;;  %637 = vmatprep.mubr.msk.f32.mxu1 %vm111_vm0, %v100_v4  ;;  %v101_v6 = vld [vmem:[#allocation5 + $0x8] sm:$0xff]  ;;  %v387_v8 = vld [vmem:[#allocation10 + $0x18] sm:$0xff]  ;;  %v286_v9 = vld [vmem:[#allocation8] sm:$0xff] }
  0x5d   :  { %v385_v7 = vld [vmem:[#allocation10 + $0x8] sm:$0xff]  ;;  %676 = vmatprep.subr.bf16.mxu0 %v675_v3  ;;  %680 = vmatprep.subr.bf16.mxu1 %v675_v3  ;;  %v384_v12 = vld [vmem:[#allocation10] sm:$0xff]  ;;  %v386_v13 = vld [vmem:[#allocation10 + $0x10] sm:$0xff] }
  0x5e   :  { %v715_v10 = vpack.c.bf16 %v387_v8, %v385_v7  ;;  %v287_v11 = vld [vmem:[#allocation8 + $0x8] sm:$0xff]  ;;  %678 = vmatpush3.bf16.msra.mxu0 %v675_v3  ;;  %682 = vmatpush3.bf16.msra.mxu1 %v675_v3  ;;  %v717_v15 = vpack.c.bf16 %v386_v13, %v384_v12  ;;  %v391_v17 = vld [vmem:[#allocation10 + $0x38] sm:$0xff]  ;;  %v288_v18 = vld [vmem:[#allocation8 + $0x10] sm:$0xff] }
  0x5f   :  { %v683_v14 = vpack.c.bf16 %v287_v11, %v286_v9  ;;  %v389_v16 = vld [vmem:[#allocation10 + $0x28] sm:$0xff]  ;;  %v289_v20 = vld [vmem:[#allocation8 + $0x18] sm:$0xff]  ;;  %v388_v21 = vld [vmem:[#allocation10 + $0x20] sm:$0xff] }
  0x60   :  { %716 = vmatprep.subr.bf16.mxu1 %v715_v10  ;;  %v719_v19 = vpack.c.bf16 %v391_v17, %v389_v16  ;;  %v390_v22 = vld [vmem:[#allocation10 + $0x30] sm:$0xff]  ;;  %v687_v23 = vpack.c.bf16 %v289_v20, %v288_v18  ;;  %v393_v24 = vld [vmem:[#allocation10 + $0x48] sm:$0xff]  ;;  %v395_v25 = vld [vmem:[#allocation10 + $0x58] sm:$0xff] }
  0x61   :  { %684 = vmatprep.subr.bf16.mxu0 %v683_v14  ;;  %v290_v26 = vld [vmem:[#allocation8 + $0x20] sm:$0xff]  ;;  %631 = vmatmul.mubr.msk.f32.vlgmr.msra.gmra.mrb[0].mxu0 %vm111_vm0, %v99_v5  ;;  %v291_v27 = vld [vmem:[#allocation8 + $0x28] sm:$0xff]  ;;  %v721_v28 = vpack.c.bf16 %v390_v22, %v388_v21  ;;  %v723_v29 = vpack.c.bf16 %v395_v25, %v393_v24  ;;  %v394_v32 = vld [vmem:[#allocation10 + $0x50] sm:$0xff] }
  0x62   :  { %638 = vmatmul.mubr.msk.f32.vlgmr.msra.gmra.mrb[0].mxu1 %vm111_vm0, %v101_v6  ;;  %686 = vmatpush3.bf16.msra.mxu0 %v683_v14  ;;  %v691_v30 = vpack.c.bf16 %v291_v27, %v290_v26  ;;  %v392_v31 = vld [vmem:[#allocation10 + $0x40] sm:$0xff]  ;;  %v397_v33 = vld [vmem:[#allocation10 + $0x68] sm:$0xff]  ;;  %v399_v34 = vld [vmem:[#allocation10 + $0x78] sm:$0xff] }
  0x63   :  { %718 = vmatpush1.bf16.msra.mxu1 %v717_v15  ;;  %688 = vmatprep.subr.bf16.mxu0 %v687_v23  ;;  %v292_v35 = vld [vmem:[#allocation8 + $0x30] sm:$0xff]  ;;  %v293_v36 = vld [vmem:[#allocation8 + $0x38] sm:$0xff]  ;;  %v725_v37 = vpack.c.bf16 %v394_v32, %v392_v31  ;;  %v727_v38 = vpack.c.bf16 %v399_v34, %v397_v33  ;;  %v396_v40 = vld [vmem:[#allocation10 + $0x60] sm:$0xff]  ;;  %v915_v15 = vmov 0.0   ;;  %v418_v33 = vlaneseq }
  0x64   :  { %720 = vmatprep.subr.bf16.mxu1 %v719_v19  ;;  %v695_v39 = vpack.c.bf16 %v293_v36, %v292_v35  ;;  %v398_v41 = vld [vmem:[#allocation10 + $0x70] sm:$0xff]  ;;  %v401_v42 = vld [vmem:[#allocation10 + $0x88] sm:$0xff]  ;;  %v403_v43 = vld [vmem:[#allocation10 + $0x98] sm:$0xff]  ;;  %492 = vmatprep.mubr.f32.mxu1 %v915_v15 }
  0x65   :  { %v294_v44 = vld [vmem:[#allocation8 + $0x40] sm:$0xff]  ;;  %v295_v45 = vld [vmem:[#allocation8 + $0x48] sm:$0xff]  ;;  %v729_v46 = vpack.c.bf16 %v398_v41, %v396_v40  ;;  %v731_v47 = vpack.c.bf16 %v403_v43, %v401_v42  ;;  %v402_v50 = vld [vmem:[#allocation10 + $0x90] sm:$0xff]  ;;  %v419_v34 = vshrl.u32 %v418_v33, 7 }
  0x66   :  { %690 = vmatpush3.bf16.msra.mxu0 %v687_v23  ;;  %v699_v48 = vpack.c.bf16 %v295_v45, %v294_v44  ;;  %v400_v49 = vld [vmem:[#allocation10 + $0x80] sm:$0xff]  ;;  %v405_v51 = vld [vmem:[#allocation10 + $0xa8] sm:$0xff]  ;;  %v407_v52 = vld [vmem:[#allocation10 + $0xb8] sm:$0xff] }
  0x67   :  { %722 = vmatpush1.bf16.msra.mxu1 %v721_v28  ;;  %692 = vmatprep.subr.bf16.mxu0 %v691_v30  ;;  %v296_v53 = vld [vmem:[#allocation8 + $0x50] sm:$0xff]  ;;  %v297_v54 = vld [vmem:[#allocation8 + $0x58] sm:$0xff]  ;;  %v733_v55 = vpack.c.bf16 %v402_v50, %v400_v49  ;;  %v735_v56 = vpack.c.bf16 %v407_v52, %v405_v51  ;;  %v404_v58 = vld [vmem:[#allocation10 + $0xa0] sm:$0xff]  ;;  %v420_v35 = vsub.s32 0, %v419_v34 }
  0x68   :  { %724 = vmatprep.subr.bf16.mxu1 %v723_v29  ;;  %v703_v57 = vpack.c.bf16 %v297_v54, %v296_v53  ;;  %v406_v59 = vld [vmem:[#allocation10 + $0xb0] sm:$0xff]  ;;  %v409_v60 = vld [vmem:[#allocation10 + $0xc8] sm:$0xff]  ;;  %v411_v61 = vld [vmem:[#allocation10 + $0xd8] sm:$0xff] }
  0x69   :  { %v737_v62 = vpack.c.bf16 %v406_v59, %v404_v58  ;;  %v739_v63 = vpack.c.bf16 %v411_v61, %v409_v60  ;;  %v298_v0 = vld [vmem:[#allocation8 + $0x60] sm:$0xff]  ;;  %v299_v1 = vld [vmem:[#allocation8 + $0x68] sm:$0xff]  ;;  %v410_v4 = vld [vmem:[#allocation10 + $0xd0] sm:$0xff] }
  0x6a   :  { %694 = vmatpush3.bf16.msra.mxu0 %v691_v30  ;;  %v408_v2 = vld [vmem:[#allocation10 + $0xc0] sm:$0xff]  ;;  %v707_v3 = vpack.c.bf16 %v299_v1, %v298_v0  ;;  %v413_v6 = vld [vmem:[#allocation10 + $0xe8] sm:$0xff]  ;;  %v415_v7 = vld [vmem:[#allocation10 + $0xf8] sm:$0xff] }
  0x6b   :  { %726 = vmatpush1.bf16.msra.mxu1 %v725_v37  ;;  %696 = vmatprep.subr.bf16.mxu0 %v695_v39  ;;  %v741_v5 = vpack.c.bf16 %v410_v4, %v408_v2  ;;  %v743_v8 = vpack.c.bf16 %v415_v7, %v413_v6  ;;  %v300_v9 = vld [vmem:[#allocation8 + $0x70] sm:$0xff]  ;;  %v301_v10 = vld [vmem:[#allocation8 + $0x78] sm:$0xff]  ;;  %v412_v11 = vld [vmem:[#allocation10 + $0xe0] sm:$0xff]  ;;  %v424_v6 = vsub.s32 1, %v419_v34 }
  0x6c   :  { %728 = vmatprep.subr.bf16.mxu1 %v727_v38  ;;  %v711_v12 = vpack.c.bf16 %v301_v10, %v300_v9  ;;  %v414_v13 = vld [vmem:[#allocation10 + $0xf0] sm:$0xff] }
  0x6d   :  { %v745_v14 = vpack.c.bf16 %v414_v13, %v412_v11  ;;  %v594_v16 = vld [vmem:[%s1087_s3] ss:$0 sm:$0xff] }
  0x6e   :  { %698 = vmatpush3.bf16.msra.mxu0 %v695_v39  ;;  %v416_v36 = vld [vmem:[%s1091_s7] sm:$0x3] }
  0x6f   :  { %730 = vmatpush1.bf16.msra.mxu1 %v729_v46  ;;  %700 = vmatprep.subr.bf16.mxu0 %v699_v48  ;;  %v421_v37 = vrot.slane %v416_v36, %v420_v35  ;;  %v599_v39 = vld [vmem:[%s1089_s5] ss:$0 sm:$0xff]  ;;  %s916_s5 = smov [#allocation11]  }
  0x70   :  { %732 = vmatprep.subr.bf16.mxu1 %v731_v47  ;;  %s580_s7 = sshll.u32 %s916_s5, 4  ;;  %s581_s7 = int_to_ptr.vmem [resolvable:$true] %s580_s7 }
  0x71   :  { %s876_s27 = scalar_lea.vmem %s581_s7, 256  ;;  %p881_p13 = scmp.lt.s32.totalorder %s581_s7, %s581_s7 }
  0x72   :  { %702 = vmatpush3.bf16.msra.mxu0 %v699_v48  ;;  %p877_p12 = scmp.ne.s32.totalorder %s581_s7, %s876_s27  ;;  %p882_p0 = scmp.lt.s32.totalorder %s876_s27, %s876_s27 }
  0x73   :  { %734 = vmatpush1.bf16.msra.mxu1 %v733_v55  ;;  %704 = vmatprep.subr.bf16.mxu0 %v703_v57 }
  0x74   :  { %736 = vmatprep.subr.bf16.mxu1 %v735_v56  ;;  %p883_p1 = por %p882_p0, %p881_p13 }
  0x76   :  { %706 = vmatpush3.bf16.msra.mxu0 %v703_v57  ;;  %p884_p2 = pnand %p883_p1, %p877_p12 }
  0x77   :  { %738 = vmatpush1.bf16.msra.mxu1 %v737_v62  ;;  %708 = vmatprep.subr.bf16.mxu0 %v707_v3 }
  0x78   :  { %740 = vmatprep.subr.bf16.mxu1 %v739_v63 }
  0x7a   :  { %710 = vmatpush3.bf16.msra.mxu0 %v707_v3 }
  0x7b   :  { %742 = vmatpush1.bf16.msra.mxu1 %v741_v5  ;;  %712 = vmatprep.subr.bf16.mxu0 %v711_v12 }
  0x7c   :  { %744 = vmatprep.subr.bf16.mxu1 %v743_v8  ;;  %v425_v8 = vrot.slane %v416_v36, %v424_v6 }
  0x7e   :  { %714 = vmatpush3.bf16.msra.mxu0 %v711_v12 }
  0x7f   :  { %746 = vmatpush1.bf16.msra.mxu1 %v745_v14 }
 0x134   :  { %v632_v17 = vpop.f32.mrb[0].mxu0 }
 0x135   :  { %v639_v18 = vpop.f32.mrb[0].mxu1  ;;  %v190_v19 = vadd.f32 %v632_v17, %v594_v16  ;;  %v184_v20 = vpop.f32.mrb[1].mxu0 }
 0x136   :  { %v271_v21 = vpop.f32.mrb[1].mxu1  ;;  %v277_v22 = vadd.f32 %v639_v18, %v594_v16  ;;  %v185_v23 = vadd.f32 %v594_v16, %v184_v20 }
 0x137   :  { %v272_v24 = vadd.f32 %v594_v16, %v271_v21  ;;  %vm194_vm1 = vcmp.ge.f32.partialorder %v190_v19, 0.0  ;;  %v196_v25 = vmul.f32 0.2, %v190_v19 }
 0x138   :  { %v195_v26 = vmul.f32 0.2, %v185_v23  ;;  %vm193_vm3 = vcmp.ge.f32.partialorder %v185_v23, 0.0  ;;  %v283_v28 = vmul.f32 0.2, %v277_v22  ;;  %vm281_vm4 = vcmp.ge.f32.partialorder %v277_v22, 0.0 }
 0x139   :  { %vm280_vm2 = vcmp.ge.f32.partialorder %v272_v24, 0.0  ;;  %v282_v27 = vmul.f32 0.2, %v272_v24  ;;  %v1058_v31 = vsel %vm194_vm1, %v190_v19, %v196_v25 }
 0x13a   :  { %v1055_v29 = vsel %vm193_vm3, %v185_v23, %v195_v26  ;;  %v285_v32 = vsel %vm281_vm4, %v277_v22, %v283_v28 }
 0x13b   :  { %v284_v30 = vsel %vm280_vm2, %v272_v24, %v282_v27  ;;  %672 = vmatprep.mubr.f32.mxu0 %v1055_v29 }
 0x13c   :  { %493 = vmatmul.mubr.f32.vlgmr.msra.gmra.mrb[2].mxu1 %v284_v30  ;;  %673 = vmatmul.mubr.f32.vlgmr.msra.gmra.mrb[2].mxu0 %v1058_v31 }
 0x13d   :  { %498 = vmatprep.mubr.f32.mxu1 %v915_v15 }
 0x140   :  { %499 = vmatmul.mubr.f32.gmra.mrb[4].mxu1 %v285_v32 }
 0x20f   :  { %v494_v38 = vpop.f32.mrb[2].mxu1  ;;  %v674_v40 = vpop.f32.mrb[2].mxu0 }
 0x210   :  { %v496_v41 = vpop.f32.mrb[3].mxu1  ;;  %v375_v42 = vpop.f32.mrb[3].mxu0  ;;  %v495_v43 = vadd.f32 %v494_v38, %v421_v37  ;;  %v381_v46 = vadd.f32 %v674_v40, %v599_v39 }
 0x211   :  { %v376_v44 = vadd.f32 %v599_v39, %v375_v42  ;;  %v497_v9 = vadd.f32 %v496_v41, %v425_v8 }
 0x213   :  { %v500_v45 = vpop.f32.mrb[4].mxu1  ;;  %v505_v49 = vmul.f32 %v495_v43, %v376_v44 }
 0x214   :  { %v501_v47 = vadd.f32 %v500_v45, %v421_v37  ;;  %v502_v48 = vpop.f32.mrb[5].mxu1 }
 0x215   :  { %507 = vadd.xlane.f32.xlu0 %v505_v49  ;;  %v503_v13 = vadd.f32 %v502_v48, %v425_v8 }
 0x216   :  { %v506_v50 = vmul.f32 %v501_v47, %v381_v46  ;;  %v565_v46 = vmul.f32 0.5, %v1055_v29 }
 0x219   :  { %509 = vadd.xlane.f32.xlu0 %v506_v50 }
 0x2a2   :  { %v508_v51 = vpop.xlane.xlu0 %507 }
 0x2a3   :  { %v511_v52 = vmul.f32 0.17677669, %v508_v51 }
 0x2a5   :  { %v513_v53 = vrot.slane %v511_v52, 4 }
 0x2a6   :  { %v510_v54 = vpop.xlane.xlu0 %509 }
 0x2a7   :  { %v514_v55 = vmax.f32 %v511_v52, %v513_v53  ;;  %v512_v56 = vmul.f32 0.17677669, %v510_v54 }
 0x2a9   :  { %v515_v57 = vrot.slane %v514_v55, 2  ;;  %v519_v58 = vrot.slane %v512_v56, 4 }
 0x2ab   :  { %v516_v59 = vmax.f32 %v514_v55, %v515_v57  ;;  %v520_v60 = vmax.f32 %v512_v56, %v519_v58 }
 0x2ad   :  { %v517_v61 = vrot.slane %v516_v59, 1  ;;  %v521_v62 = vrot.slane %v520_v60, 2 }
 0x2af   :  { %v518_v63 = vmax.f32 %v516_v59, %v517_v61  ;;  %v522_v0 = vmax.f32 %v520_v60, %v521_v62 }
 0x2b1   :  { %v525_v1 = vsub.f32 %v511_v52, %v518_v63  ;;  %v523_v2 = vrot.slane %v522_v0, 1  ;;  %v566_v52 = vmul.f32 0.5, %v1058_v31 }
 0x2b3   :  { %v527_v3 = vmul.f32 1.442695, %v525_v1  ;;  %v524_v4 = vmax.f32 %v522_v0, %v523_v2 }
 0x2b5   :  { %758 = vpow2.f32 %v527_v3  ;;  %v526_v5 = vsub.f32 %v512_v56, %v524_v4 }
 0x2b7   :  { %v529_v7 = vmul.f32 1.442695, %v526_v5 }
 0x2b9   :  { %760 = vpow2.f32 %v529_v7 }
 0x2bf   :  { %v759_v10 = vpop.eup %758 }
 0x2c0   :  { %v531_v11 = vrot.slane %v759_v10, 4  ;;  %v543_v12 = vmul.f32 %v759_v10, %v497_v9 }
 0x2c2   :  { %v532_v14 = vadd.f32 %v759_v10, %v531_v11  ;;  %vm545_vm5 = vcmp.ge.f32.partialorder %v543_v12, 0.0  ;;  %v547_v15 = vmul.f32 0.2, %v543_v12 }
 0x2c3   :  { %v761_v16 = vpop.eup %760 }
 0x2c4   :  { %v533_v17 = vrot.slane %v532_v14, 2  ;;  %v537_v18 = vrot.slane %v761_v16, 4  ;;  %v544_v19 = vmul.f32 %v761_v16, %v503_v13  ;;  %v549_v20 = vsel %vm545_vm5, %v543_v12, %v547_v15 }
 0x2c5   :  { %v551_v21 = vrot.slane %v549_v20, 4 }
 0x2c6   :  { %v534_v22 = vadd.f32 %v533_v17, %v532_v14  ;;  %v538_v23 = vadd.f32 %v761_v16, %v537_v18  ;;  %vm546_vm6 = vcmp.ge.f32.partialorder %v544_v19, 0.0  ;;  %v548_v24 = vmul.f32 0.2, %v544_v19 }
 0x2c7   :  { %v552_v25 = vadd.f32 %v551_v21, %v549_v20 }
 0x2c8   :  { %v535_v26 = vrot.slane %v534_v22, 1  ;;  %v539_v27 = vrot.slane %v538_v23, 2  ;;  %v550_v28 = vsel %vm546_vm6, %v544_v19, %v548_v24 }
 0x2c9   :  { %v557_v30 = vrot.slane %v550_v28, 4  ;;  %v553_v34 = vrot.slane %v552_v25, 2 }
 0x2ca   :  { %v536_v32 = vadd.f32 %v535_v26, %v534_v22  ;;  %v540_v33 = vadd.f32 %v539_v27, %v538_v23 }
 0x2cb   :  { %v558_v35 = vadd.f32 %v557_v30, %v550_v28  ;;  %v554_v38 = vadd.f32 %v553_v34, %v552_v25 }
 0x2cc   :  { %v541_v36 = vrot.slane %v540_v33, 1  ;;  %762 = vrcp.f32 %v536_v32 }
 0x2cd   :  { %v559_v39 = vrot.slane %v558_v35, 2  ;;  %v555_v40 = vrot.slane %v554_v38, 1 }
 0x2ce   :  { %v542_v37 = vadd.f32 %v541_v36, %v540_v33 }
 0x2cf   :  { %v560_v41 = vadd.f32 %v559_v39, %v558_v35  ;;  %v556_v43 = vadd.f32 %v555_v40, %v554_v38 }
 0x2d0   :  { %764 = vrcp.f32 %v542_v37 }
 0x2d1   :  { %v561_v44 = vrot.slane %v560_v41, 1 }
 0x2d3   :  { %v562_v49 = vadd.f32 %v561_v44, %v560_v41 }
 0x2d6   :  { %v763_v42 = vpop.eup %762 }
 0x2d7   :  { %v567_v45 = vmul.f32 0.5, %v763_v42 }
 0x2d9   :  { %v569_v47 = vmul.f32 %v567_v45, %v556_v43 }
 0x2da   :  { %v765_v48 = vpop.eup %764 }
 0x2db   :  { %v568_v50 = vmul.f32 0.5, %v765_v48  ;;  %v571_v51 = vadd.f32 %v569_v47, %v565_v46 }
 0x2dd   :  { %v570_v53 = vmul.f32 %v568_v50, %v562_v49  ;;  %573 = vst [vmem:[#allocation11] sm:$0xff] %v571_v51 }
 0x2df   :  { %v572_v54 = vadd.f32 %v570_v53, %v566_v52 }
 0x2e1   :  { %574 = vst [vmem:[#allocation11 + $0x8] sm:$0xff] %v572_v54 }
 0x2e2   :  { %887 = shalt.err (!%p884_p2)
}
 0x2e3   :  { %s888_s28 = scalar_lea.hbm %s1092_s8, 256 }
 0x2e4   :  { %p889_p3 = scmp.ne.s32.totalorder %s1092_s8, %s888_s28  ;;  %p892_p4 = scmp.lt.u32.totalorder %s888_s28, %s1092_s8 }
 0x2e6   :  { %p894_p5 = pnand %p892_p4, %p889_p3 }
 0x2e8   :  { %897 = shalt.err (!%p894_p5)
}
 0x2e9   :  { %586 = dma.vmem_to_hbm [thread:$0]  %s581_s7, 256, %s1092_s8, [#allocation4], %s908_s17, %s908_s17, %s909_s18  }
 0x2ea   :  { %904 = dma.done.wait [#allocation4], 256  }
 0x2eb   :  { %905 = vsyncadd [#allocation4], 4294967040 }
 0x2ec   :  { %590 = vsyncpa [#allocation3], 1 }
 0x2ed   :  { %591 = vsyncpa [#allocation6], 1 }
 0x2ee   :  { %592 = vsyncpa [#allocation9], 1 }
 0x2ef   :  { %593 = vsyncpa [#allocation4], 1 }

// kernel: tpu_custom_call.1
= control target key start
LH: loop header
LB: loop body
LE: loop exit
PB: predicated region body
PF: predicated region fallthrough
CT: control target
= control target key end

     0   :  { %13 = vsyncpa [#allocation3], 0  ;;  %s1084_s0 = inlined_call_operand.hbm [shape: f32[2,8,16], index: 0, kind: input, shape index: {}]   ;;  %s1085_s1 = inlined_call_operand.hbm [shape: f32[2,8,16], index: 1, kind: input, shape index: {}]   ;;  %s1086_s2 = inlined_call_operand.hbm [shape: f32[16,128], index: 2, kind: input, shape index: {}]   ;;  %s1087_s3 = inlined_call_operand.vmem [shape: f32[1,128], index: 3, kind: input, shape index: {}]   ;;  %s1088_s4 = inlined_call_operand.hbm [shape: f32[128,128], index: 4, kind: input, shape index: {}]   ;;  %s1089_s5 = inlined_call_operand.vmem [shape: f32[1,128], index: 5, kind: input, shape index: {}]   ;;  %s1090_s6 = inlined_call_operand.hbm [shape: f32[128,256], index: 6, kind: input, shape index: {}]   ;;  %s1091_s7 = inlined_call_operand.vmem [shape: f32[1,256], index: 7, kind: input, shape index: {}]   ;;  %s1092_s8 = inlined_call_operand.hbm [shape: f32[2,8,128], index: 8, kind: output, shape index: {}]  }
   0x1   :  { %14 = vsyncpa [#allocation6], 0 }
   0x2   :  { %15 = vsyncpa [#allocation9], 0 }
   0x3   :  { %16 = vsyncpa [#allocation4], 0  ;;  %s906_s27 = smov [#allocation5]   ;;  %s907_s29 = smov [#allocation8]  }
   0x4   :  { %s34_s28 = sshll.u32 %s906_s27, 4  ;;  %s60_s30 = sshll.u32 %s907_s29, 4  ;;  %s35_s28 = int_to_ptr.vmem [resolvable:$true] %s34_s28  ;;  %s962_s30 = int_to_ptr.vmem [resolvable:$true] %s60_s30 }
   0x5   :  { %s766_s11 = scalar_lea.hbm %s1085_s1, 256 }
   0x6   :  { %p767_p0 = scmp.ne.s32.totalorder %s1085_s1, %s766_s11  ;;  %p770_p1 = scmp.lt.u32.totalorder %s766_s11, %s1085_s1 }
   0x8   :  { %p772_p2 = pnand %p770_p1, %p767_p0 }
   0xa   :  { %775 = shalt.err (!%p772_p2)
}
   0xb   :  { %s776_s16 = scalar_lea.vmem %s35_s28, 256  ;;  %p781_p4 = scmp.lt.s32.totalorder %s35_s28, %s35_s28 }
   0xc   :  { %p777_p3 = scmp.ne.s32.totalorder %s35_s28, %s776_s16  ;;  %p782_p5 = scmp.lt.s32.totalorder %s776_s16, %s776_s16 }
   0xe   :  { %p783_p6 = por %p782_p5, %p781_p4 }
  0x10   :  { %p784_p7 = pnand %p783_p6, %p777_p3 }
  0x12   :  { %787 = shalt.err (!%p784_p7)
}
  0x13   :  { %s908_s17 = smov 128   ;;  %s909_s18 = smov 8  }
  0x14   :  { %40 = dma.hbm_to_vmem [thread:$0]  %s1085_s1, 256, %s35_s28, [#allocation6], %s908_s17, %s908_s17, %s909_s18  }
  0x15   :  { %s788_s23 = scalar_lea.hbm %s1088_s4, 2048 }
  0x16   :  { %p789_p8 = scmp.ne.s32.totalorder %s1088_s4, %s788_s23  ;;  %p792_p9 = scmp.lt.u32.totalorder %s788_s23, %s1088_s4 }
  0x18   :  { %p794_p10 = pnand %p792_p9, %p789_p8 }
  0x1a   :  { %797 = shalt.err (!%p794_p10)
}
  0x1b   :  { %s798_s29 = scalar_lea.vmem %s962_s30, 2048  ;;  %p803_p12 = scmp.lt.s32.totalorder %s962_s30, %s962_s30 }
  0x1c   :  { %p799_p11 = scmp.ne.s32.totalorder %s962_s30, %s798_s29  ;;  %p804_p13 = scmp.lt.s32.totalorder %s798_s29, %s798_s29 }
  0x1e   :  { %p805_p0 = por %p804_p13, %p803_p12 }
  0x20   :  { %p806_p1 = pnand %p805_p0, %p799_p11 }
  0x22   :  { %809 = shalt.err (!%p806_p1)
}
  0x23   :  { %66 = dma.hbm_to_vmem [thread:$0]  %s1088_s4, 2048, %s962_s30, [#allocation9], %s908_s17, %s908_s17, %s909_s18  }
  0x24   :  { %s910_s9 = smov [#allocation2]   ;;  %s911_s11 = smov [#allocation7]  }
  0x25   :  { %s22_s10 = sshll.u32 %s910_s9, 4  ;;  %s46_s12 = sshll.u32 %s911_s11, 4  ;;  %s23_s10 = int_to_ptr.vmem [resolvable:$true] %s22_s10  ;;  %s999_s12 = int_to_ptr.vmem [resolvable:$true] %s46_s12 }
  0x26   :  { %s810_s15 = scalar_lea.hbm %s1084_s0, 256 }
  0x27   :  { %p811_p2 = scmp.ne.s32.totalorder %s1084_s0, %s810_s15  ;;  %p814_p3 = scmp.lt.u32.totalorder %s810_s15, %s1084_s0 }
  0x29   :  { %p816_p4 = pnand %p814_p3, %p811_p2 }
  0x2b   :  { %819 = shalt.err (!%p816_p4)
}
  0x2c   :  { %s820_s4 = scalar_lea.vmem %s23_s10, 256  ;;  %p825_p6 = scmp.lt.s32.totalorder %s23_s10, %s23_s10 }
  0x2d   :  { %p821_p5 = scmp.ne.s32.totalorder %s23_s10, %s820_s4  ;;  %p826_p7 = scmp.lt.s32.totalorder %s820_s4, %s820_s4 }
  0x2f   :  { %p827_p8 = por %p826_p7, %p825_p6 }
  0x31   :  { %p828_p9 = pnand %p827_p8, %p821_p5 }
  0x33   :  { %831 = shalt.err (!%p828_p9)
}
  0x34   :  { %28 = dma.hbm_to_vmem [thread:$0]  %s1084_s0, 256, %s23_s10, [#allocation3], %s908_s17, %s908_s17, %s909_s18  }
  0x35   :  { %s832_s25 = scalar_lea.hbm %s1086_s2, 256 }
  0x36   :  { %p833_p10 = scmp.ne.s32.totalorder %s1086_s2, %s832_s25  ;;  %p836_p11 = scmp.lt.u32.totalorder %s832_s25, %s1086_s2 }
  0x38   :  { %p838_p12 = pnand %p836_p11, %p833_p10 }
  0x3a   :  { %841 = shalt.err (!%p838_p12)
}
  0x3b   :  { %s842_s28 = scalar_lea.vmem %s999_s12, 256  ;;  %p847_p0 = scmp.lt.s32.totalorder %s999_s12, %s999_s12 }
  0x3c   :  { %p843_p13 = scmp.ne.s32.totalorder %s999_s12, %s842_s28  ;;  %p848_p1 = scmp.lt.s32.totalorder %s842_s28, %s842_s28 }
  0x3e   :  { %p849_p2 = por %p848_p1, %p847_p0 }
  0x40   :  { %p850_p3 = pnand %p849_p2, %p843_p13 }
  0x42   :  { %853 = shalt.err (!%p850_p3)
}
  0x43   :  { %52 = dma.hbm_to_vmem [thread:$0]  %s1086_s2, 256, %s999_s12, [#allocation6], %s908_s17, %s908_s17, %s909_s18  }
  0x44   :  { %s912_s10 = smov [#allocation10]   ;;  %s854_s15 = scalar_lea.hbm %s1090_s6, 4096 }
  0x45   :  { %s74_s11 = sshll.u32 %s912_s10, 4  ;;  %p855_p4 = scmp.ne.s32.totalorder %s1090_s6, %s854_s15  ;;  %s75_s11 = int_to_ptr.vmem [resolvable:$true] %s74_s11 }
  0x46   :  { %p858_p5 = scmp.lt.u32.totalorder %s854_s15, %s1090_s6 }
  0x48   :  { %p860_p6 = pnand %p858_p5, %p855_p4 }
  0x4a   :  { %863 = shalt.err (!%p860_p6)
}
  0x4b   :  { %s864_s4 = scalar_lea.vmem %s75_s11, 4096  ;;  %p869_p8 = scmp.lt.s32.totalorder %s75_s11, %s75_s11 }
  0x4c   :  { %p865_p7 = scmp.ne.s32.totalorder %s75_s11, %s864_s4  ;;  %p870_p9 = scmp.lt.s32.totalorder %s864_s4, %s864_s4 }
  0x4e   :  { %p871_p10 = por %p870_p9, %p869_p8 }
  0x50   :  { %p872_p11 = pnand %p871_p10, %p865_p7 }
  0x52   :  { %875 = shalt.err (!%p872_p11)
}
  0x53   :  { %s913_s2 = smov 256   ;;  %s914_s12 = smov 16  }
  0x54   :  { %80 = dma.hbm_to_vmem [thread:$0]  %s1090_s6, 4096, %s75_s11, [#allocation9], %s913_s2, %s913_s2, %s914_s12  }
  0x55   :  { %898 = dma.done.wait [#allocation3], 256  }
  0x56   :  { %899 = vsyncadd [#allocation3], 4294967040 }
  0x57   :  { %900 = dma.done.wait [#allocation6], 512  }
  0x58   :  { %901 = vsyncadd [#allocation6], 4294966784 }
  0x59   :  { %902 = dma.done.wait [#allocation9], 6144  }
  0x5a   :  { %903 = vsyncadd [#allocation9], 4294961152  ;;  %vm111_vm0 = vcmask 130048   ;;  %v102_v0 = vld [vmem:[#allocation7] sm:$0xff]  ;;  %v103_v1 = vld [vmem:[#allocation7 + $0x8] sm:$0xff] }
  0x5b   :  { %v98_v2 = vld [vmem:[#allocation2] sm:$0xff]  ;;  %v675_v3 = vpack.c.bf16 %v103_v1, %v102_v0  ;;  %v100_v4 = vld [vmem:[#allocation5] sm:$0xff]  ;;  %v99_v5 = vld [vmem:[#allocation2 + $0x8] sm:$0xff] }
  0x5c   :  { %630 = vmatprep.mubr.msk.f32.mxu0 %vm111_vm0, %v98_v2  ;;  %637 = vmatprep.mubr.msk.f32.mxu1 %vm111_vm0, %v100_v4  ;;  %v101_v6 = vld [vmem:[#allocation5 + $0x8] sm:$0xff]  ;;  %v387_v8 = vld [vmem:[#allocation10 + $0x18] sm:$0xff]  ;;  %v286_v9 = vld [vmem:[#allocation8] sm:$0xff] }
  0x5d   :  { %v385_v7 = vld [vmem:[#allocation10 + $0x8] sm:$0xff]  ;;  %676 = vmatprep.subr.bf16.mxu0 %v675_v3  ;;  %680 = vmatprep.subr.bf16.mxu1 %v675_v3  ;;  %v384_v12 = vld [vmem:[#allocation10] sm:$0xff]  ;;  %v386_v13 = vld [vmem:[#allocation10 + $0x10] sm:$0xff] }
  0x5e   :  { %v715_v10 = vpack.c.bf16 %v387_v8, %v385_v7  ;;  %v287_v11 = vld [vmem:[#allocation8 + $0x8] sm:$0xff]  ;;  %678 = vmatpush3.bf16.msra.mxu0 %v675_v3  ;;  %682 = vmatpush3.bf16.msra.mxu1 %v675_v3  ;;  %v717_v15 = vpack.c.bf16 %v386_v13, %v384_v12  ;;  %v391_v17 = vld [vmem:[#allocation10 + $0x38] sm:$0xff]  ;;  %v288_v18 = vld [vmem:[#allocation8 + $0x10] sm:$0xff] }
  0x5f   :  { %v683_v14 = vpack.c.bf16 %v287_v11, %v286_v9  ;;  %v389_v16 = vld [vmem:[#allocation10 + $0x28] sm:$0xff]  ;;  %v289_v20 = vld [vmem:[#allocation8 + $0x18] sm:$0xff]  ;;  %v388_v21 = vld [vmem:[#allocation10 + $0x20] sm:$0xff] }
  0x60   :  { %716 = vmatprep.subr.bf16.mxu1 %v715_v10  ;;  %v719_v19 = vpack.c.bf16 %v391_v17, %v389_v16  ;;  %v390_v22 = vld [vmem:[#allocation10 + $0x30] sm:$0xff]  ;;  %v687_v23 = vpack.c.bf16 %v289_v20, %v288_v18  ;;  %v393_v24 = vld [vmem:[#allocation10 + $0x48] sm:$0xff]  ;;  %v395_v25 = vld [vmem:[#allocation10 + $0x58] sm:$0xff] }
  0x61   :  { %684 = vmatprep.subr.bf16.mxu0 %v683_v14  ;;  %v290_v26 = vld [vmem:[#allocation8 + $0x20] sm:$0xff]  ;;  %631 = vmatmul.mubr.msk.f32.vlgmr.msra.gmra.mrb[0].mxu0 %vm111_vm0, %v99_v5  ;;  %v291_v27 = vld [vmem:[#allocation8 + $0x28] sm:$0xff]  ;;  %v721_v28 = vpack.c.bf16 %v390_v22, %v388_v21  ;;  %v723_v29 = vpack.c.bf16 %v395_v25, %v393_v24  ;;  %v394_v32 = vld [vmem:[#allocation10 + $0x50] sm:$0xff] }
  0x62   :  { %638 = vmatmul.mubr.msk.f32.vlgmr.msra.gmra.mrb[0].mxu1 %vm111_vm0, %v101_v6  ;;  %686 = vmatpush3.bf16.msra.mxu0 %v683_v14  ;;  %v691_v30 = vpack.c.bf16 %v291_v27, %v290_v26  ;;  %v392_v31 = vld [vmem:[#allocation10 + $0x40] sm:$0xff]  ;;  %v397_v33 = vld [vmem:[#allocation10 + $0x68] sm:$0xff]  ;;  %v399_v34 = vld [vmem:[#allocation10 + $0x78] sm:$0xff] }
  0x63   :  { %718 = vmatpush1.bf16.msra.mxu1 %v717_v15  ;;  %688 = vmatprep.subr.bf16.mxu0 %v687_v23  ;;  %v292_v35 = vld [vmem:[#allocation8 + $0x30] sm:$0xff]  ;;  %v293_v36 = vld [vmem:[#allocation8 + $0x38] sm:$0xff]  ;;  %v725_v37 = vpack.c.bf16 %v394_v32, %v392_v31  ;;  %v727_v38 = vpack.c.bf16 %v399_v34, %v397_v33  ;;  %v396_v40 = vld [vmem:[#allocation10 + $0x60] sm:$0xff]  ;;  %v915_v15 = vmov 0.0   ;;  %v418_v33 = vlaneseq }
  0x64   :  { %720 = vmatprep.subr.bf16.mxu1 %v719_v19  ;;  %v695_v39 = vpack.c.bf16 %v293_v36, %v292_v35  ;;  %v398_v41 = vld [vmem:[#allocation10 + $0x70] sm:$0xff]  ;;  %v401_v42 = vld [vmem:[#allocation10 + $0x88] sm:$0xff]  ;;  %v403_v43 = vld [vmem:[#allocation10 + $0x98] sm:$0xff]  ;;  %492 = vmatprep.mubr.f32.mxu1 %v915_v15 }
  0x65   :  { %v294_v44 = vld [vmem:[#allocation8 + $0x40] sm:$0xff]  ;;  %v295_v45 = vld [vmem:[#allocation8 + $0x48] sm:$0xff]  ;;  %v729_v46 = vpack.c.bf16 %v398_v41, %v396_v40  ;;  %v731_v47 = vpack.c.bf16 %v403_v43, %v401_v42  ;;  %v402_v50 = vld [vmem:[#allocation10 + $0x90] sm:$0xff]  ;;  %v419_v34 = vshrl.u32 %v418_v33, 7 }
  0x66   :  { %690 = vmatpush3.bf16.msra.mxu0 %v687_v23  ;;  %v699_v48 = vpack.c.bf16 %v295_v45, %v294_v44  ;;  %v400_v49 = vld [vmem:[#allocation10 + $0x80] sm:$0xff]  ;;  %v405_v51 = vld [vmem:[#allocation10 + $0xa8] sm:$0xff]  ;;  %v407_v52 = vld [vmem:[#allocation10 + $0xb8] sm:$0xff] }
  0x67   :  { %722 = vmatpush1.bf16.msra.mxu1 %v721_v28  ;;  %692 = vmatprep.subr.bf16.mxu0 %v691_v30  ;;  %v296_v53 = vld [vmem:[#allocation8 + $0x50] sm:$0xff]  ;;  %v297_v54 = vld [vmem:[#allocation8 + $0x58] sm:$0xff]  ;;  %v733_v55 = vpack.c.bf16 %v402_v50, %v400_v49  ;;  %v735_v56 = vpack.c.bf16 %v407_v52, %v405_v51  ;;  %v404_v58 = vld [vmem:[#allocation10 + $0xa0] sm:$0xff]  ;;  %v420_v35 = vsub.s32 0, %v419_v34 }
  0x68   :  { %724 = vmatprep.subr.bf16.mxu1 %v723_v29  ;;  %v703_v57 = vpack.c.bf16 %v297_v54, %v296_v53  ;;  %v406_v59 = vld [vmem:[#allocation10 + $0xb0] sm:$0xff]  ;;  %v409_v60 = vld [vmem:[#allocation10 + $0xc8] sm:$0xff]  ;;  %v411_v61 = vld [vmem:[#allocation10 + $0xd8] sm:$0xff] }
  0x69   :  { %v737_v62 = vpack.c.bf16 %v406_v59, %v404_v58  ;;  %v739_v63 = vpack.c.bf16 %v411_v61, %v409_v60  ;;  %v298_v0 = vld [vmem:[#allocation8 + $0x60] sm:$0xff]  ;;  %v299_v1 = vld [vmem:[#allocation8 + $0x68] sm:$0xff]  ;;  %v410_v4 = vld [vmem:[#allocation10 + $0xd0] sm:$0xff] }
  0x6a   :  { %694 = vmatpush3.bf16.msra.mxu0 %v691_v30  ;;  %v408_v2 = vld [vmem:[#allocation10 + $0xc0] sm:$0xff]  ;;  %v707_v3 = vpack.c.bf16 %v299_v1, %v298_v0  ;;  %v413_v6 = vld [vmem:[#allocation10 + $0xe8] sm:$0xff]  ;;  %v415_v7 = vld [vmem:[#allocation10 + $0xf8] sm:$0xff] }
  0x6b   :  { %726 = vmatpush1.bf16.msra.mxu1 %v725_v37  ;;  %696 = vmatprep.subr.bf16.mxu0 %v695_v39  ;;  %v741_v5 = vpack.c.bf16 %v410_v4, %v408_v2  ;;  %v743_v8 = vpack.c.bf16 %v415_v7, %v413_v6  ;;  %v300_v9 = vld [vmem:[#allocation8 + $0x70] sm:$0xff]  ;;  %v301_v10 = vld [vmem:[#allocation8 + $0x78] sm:$0xff]  ;;  %v412_v11 = vld [vmem:[#allocation10 + $0xe0] sm:$0xff]  ;;  %v424_v6 = vsub.s32 1, %v419_v34 }
  0x6c   :  { %728 = vmatprep.subr.bf16.mxu1 %v727_v38  ;;  %v711_v12 = vpack.c.bf16 %v301_v10, %v300_v9  ;;  %v414_v13 = vld [vmem:[#allocation10 + $0xf0] sm:$0xff] }
  0x6d   :  { %v745_v14 = vpack.c.bf16 %v414_v13, %v412_v11  ;;  %v594_v16 = vld [vmem:[%s1087_s3] ss:$0 sm:$0xff] }
  0x6e   :  { %698 = vmatpush3.bf16.msra.mxu0 %v695_v39  ;;  %v416_v36 = vld [vmem:[%s1091_s7] sm:$0x3] }
  0x6f   :  { %730 = vmatpush1.bf16.msra.mxu1 %v729_v46  ;;  %700 = vmatprep.subr.bf16.mxu0 %v699_v48  ;;  %v421_v37 = vrot.slane %v416_v36, %v420_v35  ;;  %v599_v39 = vld [vmem:[%s1089_s5] ss:$0 sm:$0xff]  ;;  %s916_s5 = smov [#allocation11]  }
  0x70   :  { %732 = vmatprep.subr.bf16.mxu1 %v731_v47  ;;  %s580_s7 = sshll.u32 %s916_s5, 4  ;;  %s581_s7 = int_to_ptr.vmem [resolvable:$true] %s580_s7 }
  0x71   :  { %s876_s27 = scalar_lea.vmem %s581_s7, 256  ;;  %p881_p13 = scmp.lt.s32.totalorder %s581_s7, %s581_s7 }
  0x72   :  { %702 = vmatpush3.bf16.msra.mxu0 %v699_v48  ;;  %p877_p12 = scmp.ne.s32.totalorder %s581_s7, %s876_s27  ;;  %p882_p0 = scmp.lt.s32.totalorder %s876_s27, %s876_s27 }
  0x73   :  { %734 = vmatpush1.bf16.msra.mxu1 %v733_v55  ;;  %704 = vmatprep.subr.bf16.mxu0 %v703_v57 }
  0x74   :  { %736 = vmatprep.subr.bf16.mxu1 %v735_v56  ;;  %p883_p1 = por %p882_p0, %p881_p13 }
  0x76   :  { %706 = vmatpush3.bf16.msra.mxu0 %v703_v57  ;;  %p884_p2 = pnand %p883_p1, %p877_p12 }
  0x77   :  { %738 = vmatpush1.bf16.msra.mxu1 %v737_v62  ;;  %708 = vmatprep.subr.bf16.mxu0 %v707_v3 }
  0x78   :  { %740 = vmatprep.subr.bf16.mxu1 %v739_v63 }
  0x7a   :  { %710 = vmatpush3.bf16.msra.mxu0 %v707_v3 }
  0x7b   :  { %742 = vmatpush1.bf16.msra.mxu1 %v741_v5  ;;  %712 = vmatprep.subr.bf16.mxu0 %v711_v12 }
  0x7c   :  { %744 = vmatprep.subr.bf16.mxu1 %v743_v8  ;;  %v425_v8 = vrot.slane %v416_v36, %v424_v6 }
  0x7e   :  { %714 = vmatpush3.bf16.msra.mxu0 %v711_v12 }
  0x7f   :  { %746 = vmatpush1.bf16.msra.mxu1 %v745_v14 }
 0x134   :  { %v632_v17 = vpop.f32.mrb[0].mxu0 }
 0x135   :  { %v639_v18 = vpop.f32.mrb[0].mxu1  ;;  %v190_v19 = vadd.f32 %v632_v17, %v594_v16  ;;  %v184_v20 = vpop.f32.mrb[1].mxu0 }
 0x136   :  { %v271_v21 = vpop.f32.mrb[1].mxu1  ;;  %v277_v22 = vadd.f32 %v639_v18, %v594_v16  ;;  %v185_v23 = vadd.f32 %v594_v16, %v184_v20 }
 0x137   :  { %v272_v24 = vadd.f32 %v594_v16, %v271_v21  ;;  %vm194_vm1 = vcmp.ge.f32.partialorder %v190_v19, 0.0  ;;  %v196_v25 = vmul.f32 0.2, %v190_v19 }
 0x138   :  { %v195_v26 = vmul.f32 0.2, %v185_v23  ;;  %vm193_vm3 = vcmp.ge.f32.partialorder %v185_v23, 0.0  ;;  %v283_v28 = vmul.f32 0.2, %v277_v22  ;;  %vm281_vm4 = vcmp.ge.f32.partialorder %v277_v22, 0.0 }
 0x139   :  { %vm280_vm2 = vcmp.ge.f32.partialorder %v272_v24, 0.0  ;;  %v282_v27 = vmul.f32 0.2, %v272_v24  ;;  %v1058_v31 = vsel %vm194_vm1, %v190_v19, %v196_v25 }
 0x13a   :  { %v1055_v29 = vsel %vm193_vm3, %v185_v23, %v195_v26  ;;  %v285_v32 = vsel %vm281_vm4, %v277_v22, %v283_v28 }
 0x13b   :  { %v284_v30 = vsel %vm280_vm2, %v272_v24, %v282_v27  ;;  %672 = vmatprep.mubr.f32.mxu0 %v1055_v29 }
 0x13c   :  { %493 = vmatmul.mubr.f32.vlgmr.msra.gmra.mrb[2].mxu1 %v284_v30  ;;  %673 = vmatmul.mubr.f32.vlgmr.msra.gmra.mrb[2].mxu0 %v1058_v31 }
 0x13d   :  { %498 = vmatprep.mubr.f32.mxu1 %v915_v15 }
 0x140   :  { %499 = vmatmul.mubr.f32.gmra.mrb[4].mxu1 %v285_v32 }
 0x20f   :  { %v494_v38 = vpop.f32.mrb[2].mxu1  ;;  %v674_v40 = vpop.f32.mrb[2].mxu0 }
 0x210   :  { %v496_v41 = vpop.f32.mrb[3].mxu1  ;;  %v375_v42 = vpop.f32.mrb[3].mxu0  ;;  %v495_v43 = vadd.f32 %v494_v38, %v421_v37  ;;  %v381_v46 = vadd.f32 %v674_v40, %v599_v39 }
 0x211   :  { %v376_v44 = vadd.f32 %v599_v39, %v375_v42  ;;  %v497_v9 = vadd.f32 %v496_v41, %v425_v8 }
 0x213   :  { %v500_v45 = vpop.f32.mrb[4].mxu1  ;;  %v505_v49 = vmul.f32 %v495_v43, %v376_v44 }
 0x214   :  { %v501_v47 = vadd.f32 %v500_v45, %v421_v37  ;;  %v502_v48 = vpop.f32.mrb[5].mxu1 }
 0x215   :  { %507 = vadd.xlane.f32.xlu0 %v505_v49  ;;  %v503_v13 = vadd.f32 %v502_v48, %v425_v8 }
 0x216   :  { %v506_v50 = vmul.f32 %v501_v47, %v381_v46  ;;  %v565_v46 = vmul.f32 0.5, %v1055_v29 }
 0x219   :  { %509 = vadd.xlane.f32.xlu0 %v506_v50 }
 0x2a2   :  { %v508_v51 = vpop.xlane.xlu0 %507 }
 0x2a3   :  { %v511_v52 = vmul.f32 0.17677669, %v508_v51 }
 0x2a5   :  { %v513_v53 = vrot.slane %v511_v52, 4 }
 0x2a6   :  { %v510_v54 = vpop.xlane.xlu0 %509 }
 0x2a7   :  { %v514_v55 = vmax.f32 %v511_v52, %v513_v53  ;;  %v512_v56 = vmul.f32 0.17677669, %v510_v54 }
 0x2a9   :  { %v515_v57 = vrot.slane %v514_v55, 2  ;;  %v519_v58 = vrot.slane %v512_v56, 4 }
 0x2ab   :  { %v516_v59 = vmax.f32 %v514_v55, %v515_v57  ;;  %v520_v60 = vmax.f32 %v512_v56, %v519_v58 }
 0x2ad   :  { %v517_v61 = vrot.slane %v516_v59, 1  ;;  %v521_v62 = vrot.slane %v520_v60, 2 }
 0x2af   :  { %v518_v63 = vmax.f32 %v516_v59, %v517_v61  ;;  %v522_v0 = vmax.f32 %v520_v60, %v521_v62 }
 0x2b1   :  { %v525_v1 = vsub.f32 %v511_v52, %v518_v63  ;;  %v523_v2 = vrot.slane %v522_v0, 1  ;;  %v566_v52 = vmul.f32 0.5, %v1058_v31 }
 0x2b3   :  { %v527_v3 = vmul.f32 1.442695, %v525_v1  ;;  %v524_v4 = vmax.f32 %v522_v0, %v523_v2 }
 0x2b5   :  { %758 = vpow2.f32 %v527_v3  ;;  %v526_v5 = vsub.f32 %v512_v56, %v524_v4 }
 0x2b7   :  { %v529_v7 = vmul.f32 1.442695, %v526_v5 }
 0x2b9   :  { %760 = vpow2.f32 %v529_v7 }
 0x2bf   :  { %v759_v10 = vpop.eup %758 }
 0x2c0   :  { %v531_v11 = vrot.slane %v759_v10, 4  ;;  %v543_v12 = vmul.f32 %v759_v10, %v497_v9 }
 0x2c2   :  { %v532_v14 = vadd.f32 %v759_v10, %v531_v11  ;;  %vm545_vm5 = vcmp.ge.f32.partialorder %v543_v12, 0.0  ;;  %v547_v15 = vmul.f32 0.2, %v543_v12 }
 0x2c3   :  { %v761_v16 = vpop.eup %760 }
 0x2c4   :  { %v533_v17 = vrot.slane %v532_v14, 2  ;;  %v537_v18 = vrot.slane %v761_v16, 4  ;;  %v544_v19 = vmul.f32 %v761_v16, %v503_v13  ;;  %v549_v20 = vsel %vm545_vm5, %v543_v12, %v547_v15 }
 0x2c5   :  { %v551_v21 = vrot.slane %v549_v20, 4 }
 0x2c6   :  { %v534_v22 = vadd.f32 %v533_v17, %v532_v14  ;;  %v538_v23 = vadd.f32 %v761_v16, %v537_v18  ;;  %vm546_vm6 = vcmp.ge.f32.partialorder %v544_v19, 0.0  ;;  %v548_v24 = vmul.f32 0.2, %v544_v19 }
 0x2c7   :  { %v552_v25 = vadd.f32 %v551_v21, %v549_v20 }
 0x2c8   :  { %v535_v26 = vrot.slane %v534_v22, 1  ;;  %v539_v27 = vrot.slane %v538_v23, 2  ;;  %v550_v28 = vsel %vm546_vm6, %v544_v19, %v548_v24 }
 0x2c9   :  { %v557_v30 = vrot.slane %v550_v28, 4  ;;  %v553_v34 = vrot.slane %v552_v25, 2 }
 0x2ca   :  { %v536_v32 = vadd.f32 %v535_v26, %v534_v22  ;;  %v540_v33 = vadd.f32 %v539_v27, %v538_v23 }
 0x2cb   :  { %v558_v35 = vadd.f32 %v557_v30, %v550_v28  ;;  %v554_v38 = vadd.f32 %v553_v34, %v552_v25 }
 0x2cc   :  { %v541_v36 = vrot.slane %v540_v33, 1  ;;  %762 = vrcp.f32 %v536_v32 }
 0x2cd   :  { %v559_v39 = vrot.slane %v558_v35, 2  ;;  %v555_v40 = vrot.slane %v554_v38, 1 }
 0x2ce   :  { %v542_v37 = vadd.f32 %v541_v36, %v540_v33 }
 0x2cf   :  { %v560_v41 = vadd.f32 %v559_v39, %v558_v35  ;;  %v556_v43 = vadd.f32 %v555_v40, %v554_v38 }
 0x2d0   :  { %764 = vrcp.f32 %v542_v37 }
 0x2d1   :  { %v561_v44 = vrot.slane %v560_v41, 1 }
 0x2d3   :  { %v562_v49 = vadd.f32 %v561_v44, %v560_v41 }
 0x2d6   :  { %v763_v42 = vpop.eup %762 }
 0x2d7   :  { %v567_v45 = vmul.f32 0.5, %v763_v42 }
 0x2d9   :  { %v569_v47 = vmul.f32 %v567_v45, %v556_v43 }
 0x2da   :  { %v765_v48 = vpop.eup %764 }
 0x2db   :  { %v568_v50 = vmul.f32 0.5, %v765_v48  ;;  %v571_v51 = vadd.f32 %v569_v47, %v565_v46 }
 0x2dd   :  { %v570_v53 = vmul.f32 %v568_v50, %v562_v49  ;;  %573 = vst [vmem:[#allocation11] sm:$0xff] %v571_v51 }
 0x2df   :  { %v572_v54 = vadd.f32 %v570_v53, %v566_v52 }
 0x2e1   :  { %574 = vst [vmem:[#allocation11 + $0x8] sm:$0xff] %v572_v54 }
 0x2e2   :  { %887 = shalt.err (!%p884_p2)
}
 0x2e3   :  { %s888_s28 = scalar_lea.hbm %s1092_s8, 256 }
 0x2e4   :  { %p889_p3 = scmp.ne.s32.totalorder %s1092_s8, %s888_s28  ;;  %p892_p4 = scmp.lt.u32.totalorder %s888_s28, %s1092_s8 }
 0x2e6   :  { %p894_p5 = pnand %p892_p4, %p889_p3 }
 0x2e8   :  { %897 = shalt.err (!%p894_p5)
}
 0x2e9   :  { %586 = dma.vmem_to_hbm [thread:$0]  %s581_s7, 256, %s1092_s8, [#allocation4], %s908_s17, %s908_s17, %s909_s18  }
 0x2ea   :  { %904 = dma.done.wait [#allocation4], 256  }
 0x2eb   :  { %905 = vsyncadd [#allocation4], 4294967040 }
 0x2ec   :  { %590 = vsyncpa [#allocation3], 1 }
 0x2ed   :  { %591 = vsyncpa [#allocation6], 1 }
 0x2ee   :  { %592 = vsyncpa [#allocation9], 1 }
 0x2ef   :  { %593 = vsyncpa [#allocation4], 1 }

</bundles_post_ra>
